<compile_context>
chip_gen: v5e
topology: v5e:2x2
jax: 0.10.0
libtpu: 0.0.40
codegen_flags: <defaults>
</compile_context>

<pallas_src>
import functools
import math

import jax
import jax.numpy as jnp
from jax.experimental import pallas as pl
from jax.experimental.pallas import tpu as pltpu

BN_EPS = 1e-3  # EfficientNet batch_norm_epsilon

# Tile caps — sized for v7x (64 MiB VMEM); also comfortable on v5e/v6e.
_TM, _TN, _TK = 256, 256, 512
_TC_DW = 256                       # depthwise channel tile
_VMEM_LIMIT = 64 * 1024 * 1024


def _rup(x, m):
    return ((x + m - 1) // m) * m


def _act(y, act):
    if act == "silu":
        return y * jax.nn.sigmoid(y)
    if act == "sigmoid":
        return jax.nn.sigmoid(y)
    return y


# ----------------------------------------------------------------------------
# Pallas kernels
# ----------------------------------------------------------------------------
def _matmul_kernel(a_ref, b_ref, s_ref, t_ref, o_ref, acc_ref, *, act):
    # out = act((A @ B) * s + t); accumulated over the K grid axis.
    @pl.when(pl.program_id(2) == 0)
    def _():
        acc_ref[...] = jnp.zeros_like(acc_ref)

    acc_ref[...] += jnp.dot(a_ref[...], b_ref[...],
                            preferred_element_type=jnp.float32)

    @pl.when(pl.program_id(2) == pl.num_programs(2) - 1)
    def _():
        y = _act(acc_ref[...] * s_ref[...] + t_ref[...], act)
        o_ref[...] = y.astype(o_ref.dtype)


def _gated_matmul_kernel(a_ref, g_ref, b_ref, s_ref, t_ref, *rest, act, has_res):
    # SE-fused projection: out = act(((A*gate) @ B) * s + t) [+ residual]
    if has_res:
        r_ref, o_ref, acc_ref = rest
    else:
        o_ref, acc_ref = rest

    @pl.when(pl.program_id(3) == 0)
    def _():
        acc_ref[...] = jnp.zeros_like(acc_ref)

    a = a_ref[0] * g_ref[0]                      # (tm,tk) * (1,tk), bf16
    acc_ref[...] += jnp.dot(a, b_ref[...], preferred_element_type=jnp.float32)

    @pl.when(pl.program_id(3) == pl.num_programs(3) - 1)
    def _():
        y = _act(acc_ref[...] * s_ref[...] + t_ref[...], act)
        if has_res:
            y = y + r_ref[0].astype(jnp.float32)
        o_ref[0] = y.astype(o_ref.dtype)


def _dw_kernel(x_ref, w_ref, s_ref, t_ref, o_ref, p_ref, *, k, stride, hd, ho, wo):
    # Depthwise conv on one (batch, channel-tile) plane.  Input is the phase-decomposed
    # padded plane (phases stacked along H, no k^2 HBM blowup); taps are formed in-kernel
    # with static slices.  Epilogue: folded BN + swish, plus the fused SE global average
    # pool as a second (1,1,tc) output.
    tc = o_ref.shape[-1]
    acc = jnp.zeros((ho, wo, tc), jnp.float32)
    for i in range(k):
        for j in range(k):
            ph = (i % stride) * stride + (j % stride)
            a, b = i // stride, j // stride
            tap = x_ref[0, pl.ds(ph * hd + a, ho), pl.ds(b, wo), :]
            acc = acc + tap.astype(jnp.float32) * w_ref[i * k + j, :]
    y = acc * s_ref[...] + t_ref[...]
    y = y * jax.nn.sigmoid(y)                                   # swish
    o_ref[0] = y.astype(o_ref.dtype)
    p_ref[...] = jnp.sum(y, axis=(0, 1), keepdims=True) * (1.0 / (ho * wo))


def _pool_kernel(x_ref, o_ref, *, inv_denom):
    # global average pool: (B, S, C) -> (B, C); reduction over the (last) spatial axis.
    @pl.when(pl.program_id(1) == 0)
    def _():
        o_ref[...] = jnp.zeros_like(o_ref)

    o_ref[...] += jnp.sum(x_ref[...].astype(jnp.float32), axis=1)

    @pl.when(pl.program_id(1) == pl.num_programs(1) - 1)
    def _():
        o_ref[...] = o_ref[...] * inv_denom


def _se_gate_kernel(p_ref, w1_ref, b1_ref, w2_ref, b2_ref, o_ref):
    # squeeze-excitation gate: pooled -> 1x1 -> swish -> 1x1 -> sigmoid  (tiny tensors)
    h = jnp.dot(p_ref[...], w1_ref[...], preferred_element_type=jnp.float32) + b1_ref[...]
    h = h * jax.nn.sigmoid(h)
    g = jax.nn.sigmoid(
        jnp.dot(h, w2_ref[...], preferred_element_type=jnp.float32) + b2_ref[...])
    o_ref[...] = g.astype(o_ref.dtype)


# ----------------------------------------------------------------------------
# pallas_call wrappers (padding / tiling decisions)
# ----------------------------------------------------------------------------
def _matmul(a, b, scale, shift, act, out_dtype):
    """act((a @ b) * scale + shift) with M/N/K tiling, bf16 MXU, f32 epilogue."""
    M, K = a.shape
    N = b.shape[1]
    tm = min(_TM, _rup(M, 16))
    tn = min(_TN, _rup(N, 128))
    tk = min(_TK, _rup(K, 128))
    Mp, Kp, Np = _rup(M, tm), _rup(K, tk), _rup(N, tn)

    ap = jnp.pad(a.astype(jnp.bfloat16), ((0, Mp - M), (0, Kp - K)))
    bp = jnp.pad(b.astype(jnp.bfloat16), ((0, Kp - K), (0, Np - N)))
    sp = jnp.pad(scale.reshape(1, -1).astype(jnp.float32), ((0, 0), (0, Np - N)))
    tp = jnp.pad(shift.reshape(1, -1).astype(jnp.float32), ((0, 0), (0, Np - N)))

    obytes = jnp.dtype(out_dtype).itemsize
    out = pl.pallas_call(
        functools.partial(_matmul_kernel, act=act),
        out_shape=jax.ShapeDtypeStruct((Mp, Np), out_dtype),
        grid_spec=pltpu.PrefetchScalarGridSpec(
            num_scalar_prefetch=0,
            grid=(Mp // tm, Np // tn, Kp // tk),
            in_specs=[pl.BlockSpec((tm, tk), lambda i, j, k: (i, k)),
                      pl.BlockSpec((tk, tn), lambda i, j, k: (k, j)),
                      pl.BlockSpec((1, tn), lambda i, j, k: (0, j)),
                      pl.BlockSpec((1, tn), lambda i, j, k: (0, j))],
            out_specs=pl.BlockSpec((tm, tn), lambda i, j, k: (i, j)),
            scratch_shapes=[pltpu.VMEM((tm, tn), jnp.float32)]),
        compiler_params=pltpu.CompilerParams(
            dimension_semantics=("parallel", "parallel", "arbitrary"),
            vmem_limit_bytes=_VMEM_LIMIT),
        cost_estimate=pl.CostEstimate(
            flops=2 * Mp * Np * Kp,
            transcendentals=(Mp * Np if act != "none" else 0),
            bytes_accessed=2 * Mp * Kp + 2 * Kp * Np + obytes * Mp * Np),
    )(ap, bp, sp, tp)
    return out[:M, :N]


def _gated_matmul(a, gate, b, scale, shift, act, residual, out_dtype):
    """SE-fused projection: act(((a * gate[b]) @ w) * s + t) [+ residual], per batch."""
    B, S, K = a.shape
    N = b.shape[1]
    tm = min(_TM, _rup(S, 16))
    tn = min(_TN, _rup(N, 128))
    tk = min(_TK, _rup(K, 128))
    Sp, Kp, Np = _rup(S, tm), _rup(K, tk), _rup(N, tn)

    ap = jnp.pad(a.astype(jnp.bfloat16), ((0, 0), (0, Sp - S), (0, Kp - K)))
    gp = jnp.pad(gate.astype(jnp.bfloat16).reshape(B, 1, K), ((0, 0), (0, 0), (0, Kp - K)))
    bp = jnp.pad(b.astype(jnp.bfloat16), ((0, Kp - K), (0, Np - N)))
    sp = jnp.pad(scale.reshape(1, -1).astype(jnp.float32), ((0, 0), (0, Np - N)))
    tp = jnp.pad(shift.reshape(1, -1).astype(jnp.float32), ((0, 0), (0, Np - N)))

    in_specs = [pl.BlockSpec((1, tm, tk), lambda bb, i, j, k: (bb, i, k)),
                pl.BlockSpec((1, 1, tk), lambda bb, i, j, k: (bb, 0, k)),
                pl.BlockSpec((tk, tn), lambda bb, i, j, k: (k, j)),
                pl.BlockSpec((1, tn), lambda bb, i, j, k: (0, j)),
                pl.BlockSpec((1, tn), lambda bb, i, j, k: (0, j))]
    args = [ap, gp, bp, sp, tp]
    has_res = residual is not None
    if has_res:
        rp = jnp.pad(residual.astype(jnp.bfloat16), ((0, 0), (0, Sp - S), (0, Np - N)))
        in_specs.append(pl.BlockSpec((1, tm, tn), lambda bb, i, j, k: (bb, i, j)))
        args.append(rp)

    out = pl.pallas_call(
        functools.partial(_gated_matmul_kernel, act=act, has_res=has_res),
        out_shape=jax.ShapeDtypeStruct((B, Sp, Np), out_dtype),
        grid_spec=pltpu.PrefetchScalarGridSpec(
            num_scalar_prefetch=0,
            grid=(B, Sp // tm, Np // tn, Kp // tk),
            in_specs=in_specs,
            out_specs=pl.BlockSpec((1, tm, tn), lambda bb, i, j, k: (bb, i, j)),
            scratch_shapes=[pltpu.VMEM((tm, tn), jnp.float32)]),
        compiler_params=pltpu.CompilerParams(
            dimension_semantics=("parallel", "parallel", "parallel", "arbitrary"),
            vmem_limit_bytes=_VMEM_LIMIT),
        cost_estimate=pl.CostEstimate(
            flops=2 * B * Sp * Np * Kp,
            transcendentals=0,
            bytes_accessed=2 * B * Sp * Kp + 2 * Kp * Np + 2 * B * Sp * Np * 2),
    )(*args)
    return out[:, :S, :N]


def _global_pool(x):
    """(B, S, C) -> (B, C) f32 mean over S (tiled reduction over spatial)."""
    B, S, C = x.shape
    tc = min(512, _rup(C, 128))
    ts = min(2048, _rup(S, 16))
    Sp, Cp = _rup(S, ts), _rup(C, tc)
    xp = jnp.pad(x, ((0, 0), (0, Sp - S), (0, Cp - C)))
    out = pl.pallas_call(
        functools.partial(_pool_kernel, inv_denom=1.0 / S),
        out_shape=jax.ShapeDtypeStruct((B, Cp), jnp.float32),
        grid_spec=pltpu.PrefetchScalarGridSpec(
            num_scalar_prefetch=0,
            grid=(Cp // tc, Sp // ts),
            in_specs=[pl.BlockSpec((B, ts, tc), lambda c, s: (0, s, c))],
            out_specs=pl.BlockSpec((B, tc), lambda c, s: (0, c))),
        compiler_params=pltpu.CompilerParams(
            dimension_semantics=("parallel", "arbitrary"),
            vmem_limit_bytes=_VMEM_LIMIT),
    )(xp)
    return out[:, :C]


# ----------------------------------------------------------------------------
# JAX glue: BN folding, im2col (stem only), phase decomposition for depthwise
# ----------------------------------------------------------------------------
def _bn_fold(bn):
    s = bn["gamma"] * jax.lax.rsqrt(bn["var"] + BN_EPS)
    t = bn["beta"] - bn["mean"] * s
    return s, t


def _extract_taps(x, k, stride, pad):
    xp = jnp.pad(x, ((0, 0), pad, pad, (0, 0)))
    n, hp, wp, c = xp.shape
    ho = (hp - k) // stride + 1
    wo = (wp - k) // stride + 1
    taps = []
    for i in range(k):
        for j in range(k):
            taps.append(jax.lax.slice(
                xp, (0, i, j, 0),
                (n, i + (ho - 1) * stride + 1, j + (wo - 1) * stride + 1, c),
                (1, stride, stride, 1)))
    return taps, ho, wo


@functools.partial(jax.jit, static_argnames=("k", "stride", "pad", "act"))
def conv_bn_act(x, w, bn, *, k, stride, pad, act):
    n, h, wd, c = x.shape
    if k == 1 and stride == 1 and pad == (0, 0):
        patches, ho, wo = x.reshape(n * h * wd, c), h, wd
    else:
        taps, ho, wo = _extract_taps(x, k, stride, pad)
        patches = jnp.concatenate(taps, axis=-1).reshape(n * ho * wo, k * k * c)
    s, t = _bn_fold(bn)
    y = _matmul(patches, w, s, t, act, jnp.bfloat16)
    return y.reshape(n, ho, wo, -1)


@functools.partial(jax.jit, static_argnames=("k", "stride", "pad"))
def depthwise_bn_act(x, w, bn, *, k, stride, pad):
    """Depthwise conv + folded BN + swish; also returns the fused SE global pool."""
    B, H, W, C = x.shape
    tc = min(_TC_DW, _rup(C, 128))
    Cp = _rup(C, tc)
    xp = jnp.pad(x, ((0, 0), pad, pad, (0, Cp - C))).astype(jnp.bfloat16)
    Hp, Wp = xp.shape[1], xp.shape[2]
    Ho = (Hp - k) // stride + 1
    Wo = (Wp - k) // stride + 1

    # Phase-decompose the padded input for strided convs: total data volume is unchanged
    # (no k^2 blowup); the kernel then only ever needs unit-stride tap slices.
    Hd = -(-Hp // stride)
    Wd = -(-Wp // stride)
    if stride == 1:
        xph = xp
    else:
        phases = []
        for p in range(stride):
            for q in range(stride):
                phx = xp[:, p::stride, q::stride, :]
                phases.append(jnp.pad(
                    phx, ((0, 0), (0, Hd - phx.shape[1]), (0, Wd - phx.shape[2]), (0, 0))))
        xph = jnp.concatenate(phases, axis=1)     # (B, s^2*Hd, Wd, Cp)

    wv = jnp.pad(w.astype(jnp.float32), ((0, 0), (0, Cp - C)))
    s, t = _bn_fold(bn)
    sp = jnp.pad(s.reshape(1, -1).astype(jnp.float32), ((0, 0), (0, Cp - C)))
    tp = jnp.pad(t.reshape(1, -1).astype(jnp.float32), ((0, 0), (0, Cp - C)))

    y, pooled = pl.pallas_call(
        functools.partial(_dw_kernel, k=k, stride=stride, hd=Hd, ho=Ho, wo=Wo),
        out_shape=(jax.ShapeDtypeStruct((B, Ho, Wo, Cp), jnp.bfloat16),
                   jax.ShapeDtypeStruct((B, 1, Cp), jnp.float32)),
        grid_spec=pltpu.PrefetchScalarGridSpec(
            num_scalar_prefetch=0,
            grid=(B, Cp // tc),
            in_specs=[pl.BlockSpec((1, xph.shape[1], Wd, tc), lambda b, c: (b, 0, 0, c)),
                      pl.BlockSpec((k * k, tc), lambda b, c: (0, c)),
                      pl.BlockSpec((1, tc), lambda b, c: (0, c)),
                      pl.BlockSpec((1, tc), lambda b, c: (0, c))],
            out_specs=[pl.BlockSpec((1, Ho, Wo, tc), lambda b, c: (b, 0, 0, c)),
                       pl.BlockSpec((1, 1, tc), lambda b, c: (b, 0, c))]),
        compiler_params=pltpu.CompilerParams(
            dimension_semantics=("parallel", "parallel"),
            vmem_limit_bytes=_VMEM_LIMIT),
        cost_estimate=pl.CostEstimate(
            flops=2 * B * Ho * Wo * Cp * k * k,
            transcendentals=B * Ho * Wo * Cp,
            bytes_accessed=2 * xph.size + 2 * B * Ho * Wo * Cp),
    )(xph, wv, sp, tp)
    return y[..., :C], pooled[:, 0, :C]


@jax.jit
def se_gate(pooled, w1, b1, w2, b2):
    # tiny tensors (B x C, C x csq) -> single un-gridded VMEM-resident kernel
    B, C = pooled.shape
    vmem = pl.BlockSpec(memory_space=pltpu.MemorySpace.VMEM)
    return pl.pallas_call(
        _se_gate_kernel,
        out_shape=jax.ShapeDtypeStruct((B, C), jnp.bfloat16),
        in_specs=[vmem] * 5, out_specs=vmem,
    )(pooled, w1, b1.reshape(1, -1), w2, b2.reshape(1, -1))


@functools.partial(jax.jit, static_argnames=("skip",))
def se_project(x, gate, w, bn, res, *, skip):
    # projection 1x1 conv + folded BN, with the SE gate folded into the A operand and
    # the residual added in the epilogue (when the block has a skip connection).
    B, H, W, C = x.shape
    cout = w.shape[1]
    s, t = _bn_fold(bn)
    r = res.reshape(B, H * W, cout) if skip else None
    y = _gated_matmul(x.reshape(B, H * W, C), gate, w, s, t, "none", r, jnp.bfloat16)
    return y.reshape(B, H, W, cout)


@jax.jit
def pool_and_fc(x, fc_w, fc_b):
    B, H, W, C = x.shape
    pooled = _global_pool(x.reshape(B, H * W, C))                 # (B, C) f32
    ones = jnp.ones((fc_w.shape[1],), jnp.float32)
    return _matmul(pooled, fc_w, ones, fc_b, "none", jnp.float32)  # logits in f32


# ----------------------------------------------------------------------------
# EfficientNet-B7 configuration (width 2.0, depth 3.1, image_size 600)
# ----------------------------------------------------------------------------
_WIDTH, _DEPTH, _IMAGE_SIZE = 2.0, 3.1, 600
_BASE_BLOCKS = [  # (repeats, kernel, stride, expand, in_filters, out_filters, se_ratio)
    (1, 3, 1, 1, 32, 16, 0.25),
    (2, 3, 2, 6, 16, 24, 0.25),
    (2, 5, 2, 6, 24, 40, 0.25),
    (3, 3, 2, 6, 40, 80, 0.25),
    (3, 5, 1, 6, 80, 112, 0.25),
    (4, 5, 2, 6, 112, 192, 0.25),
    (1, 3, 1, 6, 192, 320, 0.25),
]


def _round_filters(f, width=_WIDTH, divisor=8):
    f *= width
    new_f = max(divisor, int(f + divisor / 2) // divisor * divisor)
    if new_f < 0.9 * f:
        new_f += divisor
    return int(new_f)


def _round_repeats(r, depth=_DEPTH):
    return int(math.ceil(depth * r))


def _same_pad(k, stride, size):
    # TF-"SAME" static padding (Conv2dStaticSamePadding, image_size tracked from 600)
    out = -(-size // stride)
    pad = max((out - 1) * stride + k - size, 0)
    return (pad // 2, pad - pad // 2)


def build_config():
    blocks = []
    size = -(-_IMAGE_SIZE // 2)  # image size tracked after the stem (stride 2)
    for (r, k, s, e, ci, co, se) in _BASE_BLOCKS:
        ci, co, r = _round_filters(ci), _round_filters(co), _round_repeats(r)
        for bi in range(r):
            stride = s if bi == 0 else 1
            cin = ci if bi == 0 else co
            blocks.append(dict(
                k=k, stride=stride, expand=e, cin=cin, cout=co, cexp=cin * e,
                se_sq=max(1, int(cin * se)), pad=_same_pad(k, stride, size),
                skip=(stride == 1 and cin == co)))
            size = -(-size // stride)
    return blocks


def init_params(key, n_classes):
    """Deterministic synthetic parameters, mirroring Network._init_weight
    (kaiming fan_out conv weights, BN gamma=1/beta=0, zero Linear bias)."""
    cfg = build_config()
    kit = iter(jax.random.split(key, 6 * len(cfg) + 8))

    def kaiming(shape, fan_out):
        return jax.random.normal(next(kit), shape, jnp.float32) * math.sqrt(2.0 / fan_out)

    def bn(c):  # eval-mode running stats: mean=0, var=1
        return dict(gamma=jnp.ones((c,), jnp.float32), beta=jnp.zeros((c,), jnp.float32),
                    mean=jnp.zeros((c,), jnp.float32), var=jnp.ones((c,), jnp.float32))

    params = {"stem_w": kaiming((3 * 3 * 6, 64), fan_out=64 * 9),  # replaced 6-ch stem
              "stem_bn": bn(64), "blocks": []}
    for bc in cfg:
        cin, cout, cexp, k, csq = bc["cin"], bc["cout"], bc["cexp"], bc["k"], bc["se_sq"]
        bp = {}
        if bc["expand"] != 1:
            bp["expand_w"] = kaiming((cin, cexp), fan_out=cexp)
            bp["bn0"] = bn(cexp)
        bp["dw_w"] = kaiming((k * k, cexp), fan_out=k * k)  # depthwise: groups=cexp
        bp["bn1"] = bn(cexp)
        bp["se_w1"] = kaiming((cexp, csq), fan_out=csq)
        bp["se_b1"] = jnp.zeros((csq,), jnp.float32)
        bp["se_w2"] = kaiming((csq, cexp), fan_out=cexp)
        bp["se_b2"] = jnp.zeros((cexp,), jnp.float32)
        bp["proj_w"] = kaiming((cexp, cout), fan_out=cout)
        bp["bn2"] = bn(cout)
        params["blocks"].append(bp)
    c_head = _round_filters(1280)  # 2560
    params["head_w"] = kaiming((cfg[-1]["cout"], c_head), fan_out=c_head)
    params["head_bn"] = bn(c_head)
    params["fc_w"] = jax.random.normal(next(kit), (c_head, n_classes), jnp.float32) / math.sqrt(c_head)
    params["fc_b"] = jnp.zeros((n_classes,), jnp.float32)
    return cfg, params


def network_forward(params, cfg, x_nchw):
    """Forward of `Network` (EfficientNet-B7 with 6-channel stem), eval mode."""
    x = jnp.transpose(x_nchw, (0, 2, 3, 1)).astype(jnp.float32)  # NCHW -> NHWC
    # replaced stem: Conv2d(6, 64, kernel_size=3, stride=2, padding=3, bias=False) + BN + swish
    x = conv_bn_act(x, params["stem_w"], params["stem_bn"], k=3, stride=2, pad=(3, 3), act="silu")
    for bc, bp in zip(cfg, params["blocks"]):
        inp = x
        if bc["expand"] != 1:
            x = conv_bn_act(x, bp["expand_w"], bp["bn0"], k=1, stride=1, pad=(0, 0), act="silu")
        x, pooled = depthwise_bn_act(x, bp["dw_w"], bp["bn1"],
                                     k=bc["k"], stride=bc["stride"], pad=bc["pad"])
        g = se_gate(pooled, bp["se_w1"], bp["se_b1"], bp["se_w2"], bp["se_b2"])
        # TODO(synk): drop_connect (stochastic depth) is training-only; identity in eval.
        x = se_project(x, g, bp["proj_w"], bp["bn2"],
                       inp if bc["skip"] else None, skip=bc["skip"])
    x = conv_bn_act(x, params["head_w"], params["head_bn"], k=1, stride=1, pad=(0, 0), act="silu")
    # TODO(synk): nn.Dropout(0.5) before the fc is training-only; identity in eval.
    return pool_and_fc(x, params["fc_w"], params["fc_b"])


if __name__ == "__main__":
    key = jax.random.PRNGKey(0)
    n_classes = 10
    cfg, params = init_params(jax.random.fold_in(key, 1), n_classes)
    # small input consistent with the module's modified 6-channel stem (NCHW like PyTorch)
    x = jax.random.normal(jax.random.fold_in(key, 2), (2, 6, 64, 64), jnp.float32)
    out = network_forward(params, cfg, x)
    out = jax.block_until_ready(out)
    assert out.shape == (2, n_classes), out.shape
    print("KERNEL_OK")
</pallas_src>

<mosaic_0001>
module attributes {stable_mosaic.version = 11 : i64} {
  func.func @_matmul_kernel(%arg0: i32, %arg1: i32, %arg2: i32, %arg3: memref<256x128xbf16, #tpu.memory_space<vmem>>, %arg4: memref<128x128xbf16, #tpu.memory_space<vmem>>, %arg5: memref<1x128xf32, #tpu.memory_space<vmem>>, %arg6: memref<1x128xf32, #tpu.memory_space<vmem>>, %arg7: memref<256x128xbf16, #tpu.memory_space<vmem>>, %arg8: memref<256x128xf32, #tpu.memory_space<vmem>>) attributes {dimension_semantics = [#tpu.dimension_semantics<parallel>, #tpu.dimension_semantics<parallel>, #tpu.dimension_semantics<arbitrary>], iteration_bounds = array<i64: 10, 1, 1>, scalar_prefetch = 0 : i64, scratch_operands = 1 : i64, tpu.core_type = #tpu.core_type<tc>, window_params = [{transform_indices = @transform_0, window_bounds = array<i64: 256, 128>}, {transform_indices = @transform_1, window_bounds = array<i64: 128, 128>}, {transform_indices = @transform_2, window_bounds = array<i64: 1, 128>}, {transform_indices = @transform_3, window_bounds = array<i64: 1, 128>}, {transform_indices = @transform_4, window_bounds = array<i64: 256, 128>}]} {
    %c0_i32 = arith.constant 0 : i32
    %0 = arith.cmpi eq, %arg2, %c0_i32 : i32
    %1 = arith.extui %0 : i1 to i32
    %c0_i32_0 = arith.constant 0 : i32
    %2 = arith.cmpi ne, %1, %c0_i32_0 : i32
    scf.if %2 {
      %cst_10 = arith.constant 0.000000e+00 : f32
      %12 = vector.broadcast %cst_10 : f32 to vector<256x128xf32>
      %c0_11 = arith.constant 0 : index
      %c0_12 = arith.constant 0 : index
      %13 = vector.load %arg8[%c0_11, %c0_12] : memref<256x128xf32, #tpu.memory_space<vmem>>, vector<256x128xf32>
      tpu.vector_store %arg8[%c0_11, %c0_12], %12 {strides = array<i32>} : memref<256x128xf32, #tpu.memory_space<vmem>>, vector<256x128xf32>,
    } else {
    }
    %c0 = arith.constant 0 : index
    %c0_1 = arith.constant 0 : index
    %3 = vector.load %arg8[%c0, %c0_1] : memref<256x128xf32, #tpu.memory_space<vmem>>, vector<256x128xf32>
    %c0_2 = arith.constant 0 : index
    %c0_3 = arith.constant 0 : index
    %4 = vector.load %arg3[%c0_2, %c0_3] : memref<256x128xbf16, #tpu.memory_space<vmem>>, vector<256x128xbf16>
    %c0_4 = arith.constant 0 : index
    %c0_5 = arith.constant 0 : index
    %5 = vector.load %arg4[%c0_4, %c0_5] : memref<128x128xbf16, #tpu.memory_space<vmem>>, vector<128x128xbf16>
    %cst = arith.constant dense<0.000000e+00> : vector<256x128xf32>
    %6 = tpu.matmul %4, %5, %cst {dimension_numbers = #tpu.dot_dimension_numbers<[1], [0], [0], [1], [0, 0, 1, 1], [], []>} : vector<256x128xbf16>, vector<128x128xbf16>, vector<256x128xf32> -> vector<256x128xf32>
    %7 = arith.addf %3, %6 : vector<256x128xf32>
    %c0_6 = arith.constant 0 : index
    %c0_7 = arith.constant 0 : index
    %8 = vector.load %arg8[%c0_6, %c0_7] : memref<256x128xf32, #tpu.memory_space<vmem>>, vector<256x128xf32>
    tpu.vector_store %arg8[%c0_6, %c0_7], %7 {strides = array<i32>} : memref<256x128xf32, #tpu.memory_space<vmem>>, vector<256x128xf32>,
    %c0_i32_8 = arith.constant 0 : i32
    %9 = arith.cmpi eq, %arg2, %c0_i32_8 : i32
    %10 = arith.extui %9 : i1 to i32
    %c0_i32_9 = arith.constant 0 : i32
    %11 = arith.cmpi ne, %10, %c0_i32_9 : i32
    scf.if %11 {
      %c0_10 = arith.constant 0 : index
      %c0_11 = arith.constant 0 : index
      %12 = vector.load %arg8[%c0_10, %c0_11] : memref<256x128xf32, #tpu.memory_space<vmem>>, vector<256x128xf32>
      %c0_12 = arith.constant 0 : index
      %c0_13 = arith.constant 0 : index
      %13 = vector.load %arg5[%c0_12, %c0_13] : memref<1x128xf32, #tpu.memory_space<vmem>>, vector<1x128xf32>
      %14 = vector.broadcast %13 : vector<1x128xf32> to vector<256x128xf32>
      %15 = arith.mulf %12, %14 : vector<256x128xf32>
      %c0_14 = arith.constant 0 : index
      %c0_15 = arith.constant 0 : index
      %16 = vector.load %arg6[%c0_14, %c0_15] : memref<1x128xf32, #tpu.memory_space<vmem>>, vector<1x128xf32>
      %17 = vector.broadcast %16 : vector<1x128xf32> to vector<256x128xf32>
      %18 = arith.addf %15, %17 : vector<256x128xf32>
      %19 = arith.negf %18 : vector<256x128xf32>
      %20 = math.exp %19 : vector<256x128xf32>
      %cst_16 = arith.constant 1.000000e+00 : f32
      %21 = vector.broadcast %cst_16 : f32 to vector<256x128xf32>
      %22 = arith.addf %21, %20 : vector<256x128xf32>
      %23 = arith.divf %21, %22 : vector<256x128xf32>
      %24 = arith.mulf %18, %23 : vector<256x128xf32>
      %25 = arith.truncf %24 : vector<256x128xf32> to vector<256x128xbf16>
      %c0_17 = arith.constant 0 : index
      %c0_18 = arith.constant 0 : index
      %26 = vector.load %arg7[%c0_17, %c0_18] : memref<256x128xbf16, #tpu.memory_space<vmem>>, vector<256x128xbf16>
      tpu.vector_store %arg7[%c0_17, %c0_18], %25 {strides = array<i32>} : memref<256x128xbf16, #tpu.memory_space<vmem>>, vector<256x128xbf16>,
    } else {
    }
    return
  }
  func.func @transform_0(%arg0: i32, %arg1: i32, %arg2: i32) -> (i32, i32) {
    %c0_i32 = arith.constant 0 : i32
    return %arg0, %arg2 : i32, i32
  }
  func.func @transform_1(%arg0: i32, %arg1: i32, %arg2: i32) -> (i32, i32) {
    %c0_i32 = arith.constant 0 : i32
    return %arg2, %arg1 : i32, i32
  }
  func.func @transform_2(%arg0: i32, %arg1: i32, %arg2: i32) -> (i32, i32) {
    %c0_i32 = arith.constant 0 : i32
    %c0_i32_0 = arith.constant 0 : i32
    return %c0_i32, %arg1 : i32, i32
  }
  func.func @transform_3(%arg0: i32, %arg1: i32, %arg2: i32) -> (i32, i32) {
    %c0_i32 = arith.constant 0 : i32
    %c0_i32_0 = arith.constant 0 : i32
    return %c0_i32, %arg1 : i32, i32
  }
  func.func @transform_4(%arg0: i32, %arg1: i32, %arg2: i32) -> (i32, i32) {
    %c0_i32 = arith.constant 0 : i32
    return %arg0, %arg1 : i32, i32
  }
}

</mosaic_0001>

<bundles_post_ra>
// kernel: conv_bn_act.1
= control target key start
LH: loop header
LB: loop body
LE: loop exit
PB: predicated region body
PF: predicated region fallthrough
CT: control target
= control target key end

     0   :  { %s2137_s15 = smov 0   ;;  %s2139_s16 = smov 0   ;;  %s3134_s0 = inlined_call_operand.vmem [shape: bf16[2560,128], index: 0, kind: input, shape index: {}]   ;;  %s3135_s1 = inlined_call_operand.vmem [shape: bf16[128,128], index: 1, kind: input, shape index: {}]   ;;  %s3136_s2 = inlined_call_operand.vmem [shape: f32[1,128], index: 2, kind: input, shape index: {}]   ;;  %s3137_s3 = inlined_call_operand.vmem [shape: f32[1,128], index: 3, kind: input, shape index: {}]   ;;  %s3138_s4 = inlined_call_operand.vmem [shape: bf16[2560,128], index: 4, kind: output, shape index: {}]  }
   0x1   :  { %s2141_s17 = smov 0  }
   0x2 LB: > { %s33_s18 = sadd.s32 1, %s2106_s16  ;;  %p1654_p0 = scmp.ge.s32.totalorder %s2110_s17, 1  ;;  %s2110_s17 = sphi %s2141_s17, %s14_s17   ;;  %s2106_s16 = sphi %s2139_s16, %s3220_s16   ;;  %s2102_s15 = sphi %s2137_s15, %s3219_s15  }
   0x3   : > { %p35_p1 = scmp.ge.s32.totalorder %s33_s18, 10  ;;  %p221_p2 = scmp.lt.s32.totalorder %s2110_s17, 11 }
   0x5   : > { %s3222_s18 = smov (%p35_p1, %s33_s18), 0  ;;  %p222_p3 = pnand %p1654_p0, %p221_p2 }
   0x6   : > { %s1655_s27 = sshll.u32 (!%p222_p3), %s2102_s15, 5 }
   0x7   : > { %225 = sbr.rel (%p222_p3) target bundleno = 341 (0x155), region = 36  ;;  %p268_p4 = scmp.lt.s32.totalorder (!%p222_p3), %s1655_s27, 319 }
   0xc   : > { %v1812_v0 = vld [vmem:[%s3135_s1 + $0x38] sm:$0xff]  ;;  %v1811_v1 = vld [vmem:[%s3135_s1 + $0x30] sm:$0xff]  ;;  %v1810_v2 = vld [vmem:[%s3135_s1 + $0x28] sm:$0xff]  ;;  %s3224_s27 = smov (!%p268_p4, %s1655_s27), 319 }
   0xd   : > { %560 = vmatpush.bf16.msra.mxu0 %v1812_v0  ;;  %1908 = vmatpush.bf16.msra.mxu1 %v1812_v0  ;;  %v1809_v3 = vld [vmem:[%s3135_s1 + $0x20] sm:$0xff]  ;;  %v1808_v4 = vld [vmem:[%s3135_s1 + $0x18] sm:$0xff]  ;;  %v1807_v5 = vld [vmem:[%s3135_s1 + $0x10] sm:$0xff]  ;;  %s1656_s8 = sshll.u32 %s3224_s27, 2 }
   0xe   : > { %1909 = vmatpush.bf16.msra.mxu2 %v1812_v0  ;;  %1910 = vmatpush.bf16.msra.mxu3 %v1812_v0  ;;  %v1806_v6 = vld [vmem:[%s3135_s1 + $0x8] sm:$0xff]  ;;  %v1805_v7 = vld [vmem:[%s3135_s1] sm:$0xff]  ;;  %s2190_s13 = scalar_lea.vmem %s3134_s0, %s1656_s8  ;;  %s2437_s23 = scalar_lea.vmem %s3138_s4, %s1656_s8 }
   0xf   : > { %v1789_v8 = vld [vmem:[%s2190_s13] sm:$0xff]  ;;  %v1790_v12 = vld [vmem:[%s2190_s13 + $0x8] sm:$0xff]  ;;  %v1791_v16 = vld [vmem:[%s2190_s13 + $0x10] sm:$0xff] }
  0x10   : > { %v1793_v9 = vld [vmem:[%s2190_s13 + $0x20] sm:$0xff]  ;;  %v1794_v13 = vld [vmem:[%s2190_s13 + $0x28] sm:$0xff]  ;;  %v1795_v17 = vld [vmem:[%s2190_s13 + $0x30] sm:$0xff] }
  0x11   : > { %561 = vmatpush.bf16.msra.mxu0 %v1811_v1  ;;  %1911 = vmatpush.bf16.msra.mxu1 %v1811_v1  ;;  %v1797_v10 = vld [vmem:[%s2190_s13 + $0x40] sm:$0xff]  ;;  %v1798_v14 = vld [vmem:[%s2190_s13 + $0x48] sm:$0xff]  ;;  %v1799_v18 = vld [vmem:[%s2190_s13 + $0x50] sm:$0xff] }
  0x12   : > { %1912 = vmatpush.bf16.msra.mxu2 %v1811_v1  ;;  %1913 = vmatpush.bf16.msra.mxu3 %v1811_v1  ;;  %v1801_v11 = vld [vmem:[%s2190_s13 + $0x60] sm:$0xff]  ;;  %v1802_v15 = vld [vmem:[%s2190_s13 + $0x68] sm:$0xff]  ;;  %v1803_v19 = vld [vmem:[%s2190_s13 + $0x70] sm:$0xff] }
  0x13   : > { %v1792_v20 = vld [vmem:[%s2190_s13 + $0x18] sm:$0xff]  ;;  %v2211_v24 = vld [vmem:[%s3136_s2] ss:$0 sm:$0xff] }
  0x14   : > { %v1796_v21 = vld [vmem:[%s2190_s13 + $0x38] sm:$0xff]  ;;  %v2216_v25 = vld [vmem:[%s3137_s3] ss:$0 sm:$0xff] }
  0x15   : > { %562 = vmatpush.bf16.msra.mxu0 %v1810_v2  ;;  %1914 = vmatpush.bf16.msra.mxu1 %v1810_v2  ;;  %v1800_v22 = vld [vmem:[%s2190_s13 + $0x58] sm:$0xff] }
  0x16   : > { %1915 = vmatpush.bf16.msra.mxu2 %v1810_v2  ;;  %1916 = vmatpush.bf16.msra.mxu3 %v1810_v2  ;;  %v1804_v23 = vld [vmem:[%s2190_s13 + $0x78] sm:$0xff] }
  0x19   : > { %563 = vmatpush.bf16.msra.mxu0 %v1809_v3  ;;  %1917 = vmatpush.bf16.msra.mxu1 %v1809_v3 }
  0x1a   : > { %1918 = vmatpush.bf16.msra.mxu2 %v1809_v3  ;;  %1919 = vmatpush.bf16.msra.mxu3 %v1809_v3 }
  0x1d   : > { %564 = vmatpush.bf16.msra.mxu0 %v1808_v4  ;;  %1920 = vmatpush.bf16.msra.mxu1 %v1808_v4 }
  0x1e   : > { %1921 = vmatpush.bf16.msra.mxu2 %v1808_v4  ;;  %1922 = vmatpush.bf16.msra.mxu3 %v1808_v4 }
  0x21   : > { %565 = vmatpush.bf16.msra.mxu0 %v1807_v5  ;;  %1923 = vmatpush.bf16.msra.mxu1 %v1807_v5 }
  0x22   : > { %1924 = vmatpush.bf16.msra.mxu2 %v1807_v5  ;;  %1925 = vmatpush.bf16.msra.mxu3 %v1807_v5 }
  0x25   : > { %566 = vmatpush.bf16.msra.mxu0 %v1806_v6  ;;  %1926 = vmatpush.bf16.msra.mxu1 %v1806_v6 }
  0x26   : > { %1927 = vmatpush.bf16.msra.mxu2 %v1806_v6  ;;  %1928 = vmatpush.bf16.msra.mxu3 %v1806_v6 }
  0x29   : > { %567 = vmatpush.bf16.msra.mxu0 %v1805_v7  ;;  %1929 = vmatpush.bf16.msra.mxu1 %v1805_v7 }
  0x2a   : > { %1930 = vmatpush.bf16.msra.mxu2 %v1805_v7  ;;  %1931 = vmatpush.bf16.msra.mxu3 %v1805_v7 }
  0x2c   : > { %568 = vmatmul.bf16.vlgmr.msra.gmra.mxu0 %v1789_v8  ;;  %588 = vmatmul.bf16.vlgmr.msra.gmra.mxu1 %v1793_v9 }
  0x2d   : > { %608 = vmatmul.bf16.vlgmr.msra.gmra.mxu2 %v1797_v10  ;;  %628 = vmatmul.bf16.vlgmr.msra.gmra.mxu3 %v1801_v11 }
  0x3c   : > { %573 = vmatmul.bf16.gmra.mxu0 %v1790_v12  ;;  %593 = vmatmul.bf16.gmra.mxu1 %v1794_v13 }
  0x3d   : > { %613 = vmatmul.bf16.gmra.mxu2 %v1798_v14  ;;  %633 = vmatmul.bf16.gmra.mxu3 %v1802_v15 }
  0x4c   : > { %578 = vmatmul.bf16.gmra.mxu0 %v1791_v16  ;;  %598 = vmatmul.bf16.gmra.mxu1 %v1795_v17 }
  0x4d   : > { %618 = vmatmul.bf16.gmra.mxu2 %v1799_v18  ;;  %638 = vmatmul.bf16.gmra.mxu3 %v1803_v19 }
  0x5c   : > { %583 = vmatmul.bf16.gmra.mxu0 %v1792_v20  ;;  %603 = vmatmul.bf16.gmra.mxu1 %v1796_v21 }
  0x5d   : > { %623 = vmatmul.bf16.gmra.mxu2 %v1800_v22  ;;  %643 = vmatmul.bf16.gmra.mxu3 %v1804_v23 }
  0xa9   : > { %v569_v26 = vpop.f32.mrf.mxu0  ;;  %v589_v27 = vpop.f32.mrf.mxu1 }
  0xaa   : > { %v752_v28 = vmul.f32 %v2211_v24, %v569_v26  ;;  %v760_v29 = vmul.f32 %v2211_v24, %v589_v27 }
  0xac   : > { %v2221_v30 = vadd.f32 %v2216_v25, %v752_v28  ;;  %v2224_v31 = vadd.f32 %v2216_v25, %v760_v29 }
  0xae   : > { %v1755_v32 = vmul.f32 -1.442695, %v2221_v30  ;;  %v1763_v33 = vmul.f32 -1.442695, %v2224_v31 }
  0xb0   : > { %1958 = vpow2.f32 %v1755_v32  ;;  %v609_v34 = vpop.f32.mrf.mxu2  ;;  %v629_v35 = vpop.f32.mrf.mxu3 }
  0xb1   : > { %1960 = vpow2.f32 %v1763_v33  ;;  %v768_v36 = vmul.f32 %v2211_v24, %v609_v34  ;;  %v776_v37 = vmul.f32 %v2211_v24, %v629_v35  ;;  %v571_v38 = vpop.f32.mrf.mxu0  ;;  %v591_v39 = vpop.f32.mrf.mxu1 }
  0xb2   : > { %v753_v40 = vmul.f32 %v2211_v24, %v571_v38  ;;  %v761_v41 = vmul.f32 %v2211_v24, %v591_v39 }
  0xb3   : > { %v2233_v42 = vadd.f32 %v2216_v25, %v768_v36  ;;  %v2236_v43 = vadd.f32 %v2216_v25, %v776_v37 }
  0xb4   : > { %v2239_v44 = vadd.f32 %v2216_v25, %v753_v40  ;;  %v2242_v45 = vadd.f32 %v2216_v25, %v761_v41 }
  0xb5   : > { %v1771_v46 = vmul.f32 -1.442695, %v2233_v42  ;;  %v1779_v47 = vmul.f32 -1.442695, %v2236_v43 }
  0xb6   : > { %v1959_v48 = vpop.eup %1958  ;;  %v1756_v51 = vmul.f32 -1.442695, %v2239_v44  ;;  %v1764_v53 = vmul.f32 -1.442695, %v2242_v45 }
  0xb7   : > { %v1961_v49 = vpop.eup %1960  ;;  %v2246_v50 = vadd.f32 1.0, %v1959_v48  ;;  %1962 = vpow2.f32 %v1771_v46 }
  0xb8   : > { %v2249_v52 = vadd.f32 1.0, %v1961_v49  ;;  %1964 = vpow2.f32 %v1779_v47  ;;  %v611_v54 = vpop.f32.mrf.mxu2  ;;  %v631_v58 = vpop.f32.mrf.mxu3 }
  0xb9   : > { %1966 = vrcp.f32 %v2246_v50  ;;  %v769_v55 = vmul.f32 %v2211_v24, %v611_v54  ;;  %v959_v62 = vand.u32 2147483648, %v2246_v50  ;;  %v957_v2 = vand.u32 2147483647, %v2246_v50  ;;  %v574_v4 = vpop.f32.mrf.mxu0  ;;  %v594_v5 = vpop.f32.mrf.mxu1 }
  0xba   : > { %1968 = vrcp.f32 %v2249_v52  ;;  %v777_v3 = vmul.f32 %v2211_v24, %v631_v58  ;;  %vm953_vm0 = vweird.f32 %v2246_v50  ;;  %v1079_v8 = vand.u32 2147483648, %v2249_v52 }
  0xbb   : > { %1970 = vpow2.f32 %v1756_v51  ;;  %v2256_v57 = vadd.f32 %v2216_v25, %v769_v55  ;;  %vm1073_vm1 = vweird.f32 %v2249_v52  ;;  %v1077_v12 = vand.u32 2147483647, %v2249_v52 }
  0xbc   : > { %1972 = vpow2.f32 %v1764_v53  ;;  %v960_v13 = vor.u32 1.1754944e-38, %v959_v62  ;;  %v754_v15 = vmul.f32 %v2211_v24, %v574_v4  ;;  %v762_v16 = vmul.f32 %v2211_v24, %v594_v5 }
  0xbd   : > { %v1963_v56 = vpop.eup %1962  ;;  %v1772_v9 = vmul.f32 -1.442695, %v2256_v57  ;;  %vm2283_vm2 = vcmp.eq.f32.partialorder %v957_v2, 8.507059e+37  ;;  %v2292_v21 = vadd.f32 %v2216_v25, %v777_v3  ;;  %v1080_v23 = vor.u32 1.1754944e-38, %v1079_v8 }
  0xbe   : > { %v1965_v59 = vpop.eup %1964  ;;  %v2258_v60 = vadd.f32 1.0, %v1963_v56  ;;  %vm2299_vm4 = vcmp.eq.f32.partialorder %v1077_v12, 8.507059e+37  ;;  %v2310_v35 = vadd.f32 %v2216_v25, %v754_v15  ;;  %v2313_v36 = vadd.f32 %v2216_v25, %v762_v16 }
  0xbf   : > { %v2260_v61 = vpop.eup %1966  ;;  %v2263_v63 = vadd.f32 1.0, %v1965_v59  ;;  %v1780_v39 = vmul.f32 -1.442695, %v2292_v21 }
  0xc0   : > { %v2265_v0 = vpop.eup %1968  ;;  %v949_v1 = vmul.f32 %v2260_v61, %v2246_v50  ;;  %1974 = vrcp.f32 %v2258_v60  ;;  %vm954_vm3 = vweird.f32 %v2260_v61  ;;  %v1199_v29 = vand.u32 2147483648, %v2258_v60 }
  0xc1   : > { %v1971_v6 = vpop.eup %1970  ;;  %v1069_v7 = vmul.f32 %v2265_v0, %v2249_v52  ;;  %1976 = vrcp.f32 %v2263_v63  ;;  %v1319_v32 = vand.u32 2147483648, %v2263_v63  ;;  %v1197_v34 = vand.u32 2147483647, %v2258_v60  ;;  %vm2325_vm6 = vmor %vm953_vm0, %vm954_vm3  ;;  %v576_v40 = vpop.f32.mrf.mxu0 }
  0xc2   : > { %v1973_v10 = vpop.eup %1972  ;;  %v950_v11 = vsub.f32 1.0, %v949_v1  ;;  %v2287_v19 = vadd.f32 1.0, %v1971_v6  ;;  %1978 = vpow2.f32 %v1772_v9  ;;  %vm1074_vm5 = vweird.f32 %v2265_v0 }
  0xc3   : > { %v1070_v14 = vsub.f32 1.0, %v1069_v7  ;;  %v2289_v20 = vadd.f32 1.0, %v1973_v10  ;;  %vm1193_vm7 = vweird.f32 %v2258_v60  ;;  %v1200_v49 = vor.u32 1.1754944e-38, %v1199_v29  ;;  %vm2341_vm8 = vmor %vm1073_vm1, %vm1074_vm5 }
  0xc4   : > { %v951_v17 = vmul.f32 %v2260_v61, %v950_v11  ;;  %1980 = vrcp.f32 %v2287_v19  ;;  %v972_v47 = vand.u32 2147483647, %v2287_v19  ;;  %v1317_v51 = vand.u32 2147483647, %v2263_v63  ;;  %v614_v11 = vpop.f32.mrf.mxu2 }
  0xc5   : > { %v1071_v22 = vmul.f32 %v2265_v0, %v1070_v14  ;;  %1982 = vrcp.f32 %v2289_v20  ;;  %v2337_v50 = vor.u32 1.1754944e-38, %v1319_v32  ;;  %vm2347_vm10 = vcmp.eq.f32.partialorder %v1197_v34, 8.507059e+37  ;;  %v634_v32 = vpop.f32.mrf.mxu3 }
  0xc6   : > { %v2296_v26 = vpop.eup %1974  ;;  %v952_v27 = vadd.f32 %v2260_v61, %v951_v17  ;;  %vm968_vm11 = vweird.f32 %v2287_v19  ;;  %v974_v58 = vand.u32 2147483648, %v2287_v19  ;;  %1984 = vpow2.f32 %v1780_v39 }
  0xc7   : > { %v1189_v33 = vmul.f32 %v2296_v26, %v2258_v60  ;;  %v2315_v37 = vpop.eup %1976  ;;  %v1072_v38 = vadd.f32 %v2265_v0, %v1071_v22  ;;  %vm1194_vm9 = vweird.f32 %v2296_v26  ;;  %vm2362_vm12 = vcmp.eq.f32.partialorder %v972_v47, 8.507059e+37 }
  0xc8   : > { %v1309_v46 = vmul.f32 %v2315_v37, %v2263_v63  ;;  %v956_v48 = vsel %vm2325_vm6, %v2260_v61, %v952_v27  ;;  %v1979_v53 = vpop.eup %1978  ;;  %vm1313_vm13 = vweird.f32 %v2263_v63  ;;  %v1094_v6 = vand.u32 2147483648, %v2289_v20  ;;  %vm2380_vm15 = vmor %vm1193_vm7, %vm1194_vm9 }
  0xc9   : > { %v1190_v41 = vsub.f32 1.0, %v1189_v33  ;;  %v1076_v52 = vsel %vm2341_vm8, %v2265_v0, %v1072_v38  ;;  %v2356_v62 = vadd.f32 1.0, %v1979_v53  ;;  %v961_v1 = vsel %vm2283_vm2, %v960_v13, %v956_v48 }
  0xca   : > { %v1981_v59 = vpop.eup %1980  ;;  %v1310_v61 = vsub.f32 1.0, %v1309_v46  ;;  %v1092_v0 = vand.u32 2147483647, %v2289_v20  ;;  %v1757_v7 = vmul.f32 -1.442695, %v2310_v35  ;;  %v1081_v8 = vsel %vm2299_vm4, %v1080_v23, %v1076_v52 }
  0xcb   : > { %v1191_v55 = vmul.f32 %v2296_v26, %v1190_v41  ;;  %v964_v3 = vmul.f32 %v1981_v59, %v2287_v19  ;;  %v1983_v5 = vpop.eup %1982  ;;  %1986 = vrcp.f32 %v2356_v62  ;;  %vm1088_vm14 = vweird.f32 %v2289_v20 }
  0xcc   : > { %v1084_v10 = vmul.f32 %v1983_v5, %v2289_v20  ;;  %v1428_v12 = vmul.f32 %v961_v1, %v2221_v30  ;;  %v1311_v14 = vmul.f32 %v2315_v37, %v1310_v61  ;;  %vm1314_vm0 = vweird.f32 %v2315_v37  ;;  %v1985_v18 = vpop.eup %1984 }
  0xcd   : > { %v1192_v2 = vadd.f32 %v2296_v26, %v1191_v55  ;;  %v965_v9 = vsub.f32 1.0, %v964_v3  ;;  %v975_v15 = vor.u32 1.1754944e-38, %v974_v58  ;;  %vm969_vm1 = vweird.f32 %v1981_v59  ;;  %vm2423_vm8 = vmor %vm1313_vm13, %vm1314_vm0 }
  0xce   : > { %v1085_v30 = vsub.f32 1.0, %v1084_v10  ;;  %v1436_v22 = vmul.f32 %v1081_v8, %v2224_v31  ;;  %vm2390_vm2 = vcmp.eq.f32.partialorder %v1317_v51, 8.507059e+37  ;;  %vm2394_vm3 = vcmp.eq.f32.partialorder %v1092_v0, 8.507059e+37  ;;  %vm970_vm6 = vmor %vm968_vm11, %vm969_vm1 }
  0xcf   : > { %v1196_v16 = vsel %vm2380_vm15, %v2296_v26, %v1192_v2  ;;  %v966_v17 = vmul.f32 %v1981_v59, %v965_v9  ;;  %v1095_v27 = vor.u32 1.1754944e-38, %v1094_v6  ;;  %1988 = vpow2.f32 %v1757_v7  ;;  %v616_v2 = vpop.f32.mrf.mxu2 }
  0xd0   : > { %v1086_v29 = vmul.f32 %v1983_v5, %v1085_v30  ;;  %vm1089_vm4 = vweird.f32 %v1983_v5  ;;  %vm1208_vm5 = vweird.f32 %v2356_v62  ;;  %v2399_v26 = vadd.f32 1.0, %v1985_v18 }
  0xd1   : > { %v967_v28 = vadd.f32 %v1981_v59, %v966_v17  ;;  %v1987_v33 = vpop.eup %1986  ;;  %v1201_v31 = vsel %vm2347_vm10, %v1200_v49, %v1196_v16  ;;  %v1312_v34 = vadd.f32 %v2315_v37, %v1311_v14  ;;  %v1765_v38 = vmul.f32 -1.442695, %v2313_v36  ;;  %vm1090_vm7 = vmor %vm1088_vm14, %vm1089_vm4  ;;  %v636_v17 = vpop.f32.mrf.mxu3 }
  0xd2   : > { %v770_v39 = vmul.f32 %v2211_v24, %v614_v11  ;;  %v1087_v46 = vadd.f32 %v1983_v5, %v1086_v29  ;;  %v1204_v47 = vmul.f32 %v1987_v33, %v2356_v62  ;;  %v1212_v48 = vand.u32 2147483647, %v2356_v62 }
  0xd3   : > { %v971_v41 = vsel %vm970_vm6, %v1981_v59, %v967_v28  ;;  %v1214_v19 = vand.u32 2147483648, %v2356_v62  ;;  %1990 = vrcp.f32 %v2399_v26  ;;  %v778_v51 = vmul.f32 %v2211_v24, %v634_v32 }
  0xd4   : > { %v976_v49 = vsel %vm2362_vm12, %v975_v15, %v971_v41  ;;  %v1091_v55 = vsel %vm1090_vm7, %v1983_v5, %v1087_v46  ;;  %v1205_v56 = vsub.f32 1.0, %v1204_v47  ;;  %v755_v20 = vmul.f32 %v2211_v24, %v576_v40 }
  0xd5   : > { %v1429_v54 = vmul.f32 %v976_v49, %v2239_v44  ;;  %v1989_v58 = vpop.eup %1988  ;;  %v1316_v59 = vsel %vm2423_vm8, %v2315_v37, %v1312_v34  ;;  %v1096_v63 = vsel %vm2394_vm3, %v1095_v27, %v1091_v55  ;;  %1992 = vpow2.f32 %v1765_v38  ;;  %v596_v37 = vpop.f32.mrf.mxu1 }
  0xd6   : > { %v2442_v44 = vadd.f32 %v2216_v25, %v770_v39  ;;  %v1437_v61 = vmul.f32 %v1096_v63, %v2242_v45  ;;  %v1206_v1 = vmul.f32 %v1987_v33, %v1205_v56  ;;  %vm1209_vm9 = vweird.f32 %v1987_v33 }
  0xd7   : > { %v1816_v52 = vpack.c.bf16 %v1429_v54, %v1428_v12  ;;  %v1444_v3 = vmul.f32 %v1201_v31, %v2233_v42  ;;  %v2446_v4 = vadd.f32 1.0, %v1989_v58  ;;  %v2450_v0 = vadd.f32 %v2216_v25, %v778_v51  ;;  %vm1210_vm10 = vmor %vm1208_vm5, %vm1209_vm9 }
  0xd8   : > { %v1773_v5 = vmul.f32 -1.442695, %v2442_v44  ;;  %v1321_v6 = vsel %vm2390_vm2, %v2337_v50, %v1316_v59  ;;  %v1836_v45 = vpack.c.bf16 %v1437_v61, %v1436_v22  ;;  %v1207_v7 = vadd.f32 %v1987_v33, %v1206_v1 }
  0xd9   : > { %1817 = vst [vmem:[%s2437_s23] sm:$0xff] %v1816_v52   ;;  %v2457_v8 = vadd.f32 %v2216_v25, %v755_v20  ;;  %v1991_v9 = vpop.eup %1990  ;;  %v1215_v42 = vor.u32 1.1754944e-38, %v1214_v19  ;;  %1994 = vrcp.f32 %v2446_v4  ;;  %v763_v10 = vmul.f32 %v2211_v24, %v596_v37 }
  0xda   : > { %v771_v11 = vmul.f32 %v2211_v24, %v616_v2  ;;  %1896 = vst [vmem:[%s2437_s23 + $0x20] sm:$0xff] %v1836_v45   ;;  %v1211_v12 = vsel %vm1210_vm10, %v1987_v33, %v1207_v7  ;;  %vm1213_vm11 = vcmp.eq.f32.partialorder %v1212_v48, 8.507059e+37  ;;  %v1324_v50 = vmul.f32 %v1991_v9, %v2399_v26 }
  0xdb   : > { %1996 = vpow2.f32 %v1773_v5  ;;  %v1993_v13 = vpop.eup %1992  ;;  %v1216_v14 = vsel %vm1213_vm11, %v1215_v42, %v1211_v12  ;;  %v1332_v15 = vand.u32 2147483647, %v2399_v26  ;;  %v1334_v62 = vand.u32 2147483648, %v2399_v26 }
  0xdc   : > { %v1781_v16 = vmul.f32 -1.442695, %v2450_v0  ;;  %v1445_v30 = vmul.f32 %v1216_v14, %v2256_v57  ;;  %v1325_v18 = vsub.f32 1.0, %v1324_v50  ;;  %v2470_v22 = vadd.f32 1.0, %v1993_v13 }
  0xdd   : > { %v1758_v60 = vmul.f32 -1.442695, %v2457_v8  ;;  %vm1329_vm12 = vweird.f32 %v1991_v9  ;;  %v2474_v23 = vadd.f32 %v2216_v25, %v763_v10  ;;  %v2477_v27 = vadd.f32 %v2216_v25, %v771_v11 }
  0xde   : > { %1998 = vpow2.f32 %v1781_v16  ;;  %v1856_v28 = vpack.c.bf16 %v1445_v30, %v1444_v3  ;;  %v1326_v29 = vmul.f32 %v1991_v9, %v1325_v18  ;;  %v779_v57 = vmul.f32 %v2211_v24, %v636_v17 }
  0xdf   : > { %2000 = vrcp.f32 %v2470_v22  ;;  %v2481_v32 = vpop.eup %1994  ;;  %v1766_v33 = vmul.f32 -1.442695, %v2474_v23  ;;  %v1452_v34 = vmul.f32 %v1321_v6, %v2236_v43  ;;  %vm1328_vm13 = vweird.f32 %v2399_v26 }
  0xe0   : > { %2002 = vpow2.f32 %v1758_v60  ;;  %1900 = vst [vmem:[%s2437_s23 + $0x40] sm:$0xff] %v1856_v28   ;;  %v1327_v38 = vadd.f32 %v1991_v9, %v1326_v29  ;;  %v979_v39 = vmul.f32 %v2481_v32, %v2446_v4  ;;  %vm1330_vm14 = vmor %vm1328_vm13, %vm1329_vm12  ;;  %v1335_v40 = vor.u32 1.1754944e-38, %v1334_v62 }
  0xe1   : > { %v1997_v31 = vpop.eup %1996  ;;  %2004 = vpow2.f32 %v1766_v33  ;;  %v1774_v46 = vmul.f32 -1.442695, %v2477_v27  ;;  %vm1333_vm15 = vcmp.eq.f32.partialorder %v1332_v15, 8.507059e+37  ;;  %v2494_v43 = vadd.f32 %v2216_v25, %v779_v57 }
  0xe2   : > { %v2490_v41 = vadd.f32 1.0, %v1997_v31  ;;  %v1331_v47 = vsel %vm1330_vm14, %v1991_v9, %v1327_v38  ;;  %v980_v48 = vsub.f32 1.0, %v979_v39  ;;  %vm983_vm0 = vweird.f32 %v2446_v4 }
  0xe3   : > { %v1336_v19 = vsel %vm1333_vm15, %v1335_v40, %v1331_v47  ;;  %v987_v26 = vand.u32 2147483647, %v2446_v4  ;;  %v989_v55 = vand.u32 2147483648, %v2446_v4  ;;  %v1107_v59 = vand.u32 2147483647, %v2470_v22 }
  0xe4   : > { %v1999_v49 = vpop.eup %1998  ;;  %2006 = vrcp.f32 %v2490_v41  ;;  %v1453_v53 = vmul.f32 %v1336_v19, %v2292_v21  ;;  %v981_v54 = vmul.f32 %v2481_v32, %v980_v48  ;;  %v1782_v63 = vmul.f32 -1.442695, %v2494_v43 }
  0xe5   : > { %v2499_v51 = vpop.eup %2000  ;;  %v2504_v56 = vadd.f32 1.0, %v1999_v49  ;;  %2008 = vpow2.f32 %v1774_v46  ;;  %vm984_vm1 = vweird.f32 %v2481_v32  ;;  %vm2513_vm2 = vcmp.eq.f32.partialorder %v987_v26, 8.507059e+37 }
  0xe6   : > { %v2003_v20 = vpop.eup %2002  ;;  %v1099_v58 = vmul.f32 %v2499_v51, %v2470_v22  ;;  %v1876_v52 = vpack.c.bf16 %v1453_v53, %v1452_v34  ;;  %v982_v61 = vadd.f32 %v2481_v32, %v981_v54  ;;  %v1109_v2 = vand.u32 2147483648, %v2470_v22  ;;  %vm2527_vm3 = vmor %vm983_vm0, %vm984_vm1  ;;  %v579_v53 = vpop.f32.mrf.mxu0 }
  0xe7   : > { %2010 = vrcp.f32 %v2504_v56  ;;  %v2005_v21 = vpop.eup %2004  ;;  %v1227_v3 = vand.u32 2147483647, %v2490_v41  ;;  %v1229_v5 = vand.u32 2147483648, %v2490_v41  ;;  %v2521_v6 = vadd.f32 1.0, %v2003_v20  ;;  %v599_v54 = vpop.f32.mrf.mxu1 }
  0xe8   : > { %v1100_v37 = vsub.f32 1.0, %v1099_v58  ;;  %1904 = vst [vmem:[%s2437_s23 + $0x60] sm:$0xff] %v1876_v52   ;;  %v2523_v45 = vadd.f32 1.0, %v2005_v21  ;;  %2012 = vpow2.f32 %v1782_v63  ;;  %v990_v42 = vor.u32 1.1754944e-38, %v989_v55 }
  0xe9   : > { %vm1103_vm4 = vweird.f32 %v2470_v22  ;;  %vm2533_vm5 = vcmp.eq.f32.partialorder %v1107_v59, 8.507059e+37  ;;  %v986_v12 = vsel %vm2527_vm3, %v2481_v32, %v982_v61  ;;  %vm1104_vm6 = vweird.f32 %v2499_v51  ;;  %v619_v59 = vpop.f32.mrf.mxu2 }
  0xea   : > { %v2007_v7 = vpop.eup %2006  ;;  %v1101_v10 = vmul.f32 %v2499_v51, %v1100_v37  ;;  %2014 = vrcp.f32 %v2521_v6  ;;  %v1110_v14 = vor.u32 1.1754944e-38, %v1109_v2  ;;  %vm1223_vm7 = vweird.f32 %v2490_v41  ;;  %vm2557_vm9 = vmor %vm1103_vm4, %vm1104_vm6 }
  0xeb   : > { %v1219_v4 = vmul.f32 %v2007_v7, %v2490_v41  ;;  %v2009_v50 = vpop.eup %2008  ;;  %v1349_v15 = vand.u32 2147483648, %v2504_v56  ;;  %vm2548_vm8 = vcmp.eq.f32.partialorder %v1227_v3, 8.507059e+37  ;;  %v1230_v30 = vor.u32 1.1754944e-38, %v1229_v5 }
  0xec   : > { %v1102_v13 = vadd.f32 %v2499_v51, %v1101_v10  ;;  %2016 = vrcp.f32 %v2523_v45  ;;  %v991_v18 = vsel %vm2513_vm2, %v990_v42, %v986_v12  ;;  %vm1343_vm10 = vweird.f32 %v2504_v56 }
  0xed   : > { %v2546_v62 = vpop.eup %2010  ;;  %v1220_v16 = vsub.f32 1.0, %v1219_v4  ;;  %v1347_v29 = vand.u32 2147483647, %v2504_v56  ;;  %v1002_v57 = vand.u32 2147483647, %v2521_v6  ;;  %vm1224_vm11 = vweird.f32 %v2007_v7 }
  0xee   : > { %v1339_v28 = vmul.f32 %v2546_v62, %v2504_v56  ;;  %v2013_v32 = vpop.eup %2012  ;;  %v1106_v33 = vsel %vm2557_vm9, %v2499_v51, %v1102_v13  ;;  %v1004_v22 = vand.u32 2147483648, %v2521_v6  ;;  %v2570_v38 = vor.u32 1.1754944e-38, %v1349_v15  ;;  %vm1225_vm14 = vmor %vm1223_vm7, %vm1224_vm11 }
  0xef   : > { %v1221_v31 = vmul.f32 %v2007_v7, %v1220_v16  ;;  %v1122_v39 = vand.u32 2147483647, %v2523_v45  ;;  %v2573_v40 = vadd.f32 1.0, %v2009_v50  ;;  %v2576_v47 = vmul.f32 %v991_v18, %v2310_v35 }
  0xf0   : > { %v1340_v34 = vsub.f32 1.0, %v1339_v28  ;;  %v2015_v46 = vpop.eup %2014  ;;  %vm1344_vm12 = vweird.f32 %v2546_v62  ;;  %vm998_vm13 = vweird.f32 %v2521_v6  ;;  %v1111_v49 = vsel %vm2533_vm5, %v1110_v14, %v1106_v33  ;;  %v639_v28 = vpop.f32.mrf.mxu3 }
  0xf1   : > { %v1222_v48 = vadd.f32 %v2007_v7, %v1221_v31  ;;  %v994_v26 = vmul.f32 %v2015_v46, %v2521_v6  ;;  %vm2586_vm15 = vcmp.eq.f32.partialorder %v1002_v57, 8.507059e+37  ;;  %vm1118_vm0 = vweird.f32 %v2523_v45  ;;  %vm2618_vm3 = vmor %vm1343_vm10, %vm1344_vm12 }
  0xf2   : > { %v1341_v19 = vmul.f32 %v2546_v62, %v1340_v34  ;;  %v2591_v35 = vadd.f32 1.0, %v2013_v32  ;;  %v2017_v55 = vpop.eup %2016  ;;  %v1005_v58 = vor.u32 1.1754944e-38, %v1004_v22  ;;  %v1124_v41 = vand.u32 2147483648, %v2523_v45 }
  0xf3   : > { %v1226_v20 = vsel %vm1225_vm14, %v2007_v7, %v1222_v48  ;;  %2018 = vrcp.f32 %v2573_v40  ;;  %v995_v61 = vsub.f32 1.0, %v994_v26  ;;  %v1114_v21 = vmul.f32 %v2017_v55, %v2523_v45 }
  0xf4   : > { %v1231_v63 = vsel %vm2548_vm8, %v1230_v30, %v1226_v20  ;;  %v2598_v52 = vadd.f32 %v2546_v62, %v1341_v19  ;;  %vm2601_vm1 = vcmp.eq.f32.partialorder %v1122_v39, 8.507059e+37  ;;  %vm999_vm2 = vweird.f32 %v2015_v46  ;;  %v621_v19 = vpop.f32.mrf.mxu2 }
  0xf5   : > { %v1244_v37 = vand.u32 2147483648, %v2573_v40  ;;  %v756_v2 = vmul.f32 %v2211_v24, %v579_v53  ;;  %v764_v3 = vmul.f32 %v2211_v24, %v599_v54  ;;  %v996_v5 = vmul.f32 %v2015_v46, %v995_v61  ;;  %vm1000_vm7 = vmor %vm998_vm13, %vm999_vm2 }
  0xf6   : > { %v1115_v7 = vsub.f32 1.0, %v1114_v21  ;;  %v1242_v9 = vand.u32 2147483647, %v2573_v40  ;;  %2020 = vrcp.f32 %v2591_v35  ;;  %v1438_v42 = vmul.f32 %v1111_v49, %v2313_v36  ;;  %v601_v49 = vpop.f32.mrf.mxu1 }
  0xf7   : > { %v2612_v10 = vmul.f32 %v1231_v63, %v2442_v44  ;;  %vm1119_vm4 = vweird.f32 %v2017_v55  ;;  %v1125_v12 = vor.u32 1.1754944e-38, %v1124_v41  ;;  %v1346_v4 = vsel %vm2618_vm3, %v2546_v62, %v2598_v52 }
  0xf8   : > { %v997_v50 = vadd.f32 %v2015_v46, %v996_v5  ;;  %v1116_v36 = vmul.f32 %v2017_v55, %v1115_v7  ;;  %vm1238_vm5 = vweird.f32 %v2573_v40  ;;  %v1245_v44 = vor.u32 1.1754944e-38, %v1244_v37  ;;  %vm1120_vm9 = vmor %vm1118_vm0, %vm1119_vm4  ;;  %v641_v11 = vpop.f32.mrf.mxu3 }
  0xf9   : > { %v2019_v13 = vpop.eup %2018  ;;  %vm2627_vm6 = vcmp.eq.f32.partialorder %v1347_v29, 8.507059e+37  ;;  %v1362_v56 = vand.u32 2147483647, %v2591_v35  ;;  %v2636_v15 = vadd.f32 %v2216_v25, %v756_v2  ;;  %v2639_v62 = vadd.f32 %v2216_v25, %v764_v3 }
  0xfa   : > { %v772_v16 = vmul.f32 %v2211_v24, %v619_v59  ;;  %v1001_v17 = vsel %vm1000_vm7, %v2015_v46, %v997_v50  ;;  %v1117_v30 = vadd.f32 %v2017_v55, %v1116_v36  ;;  %v1234_v18 = vmul.f32 %v2019_v13, %v2573_v40  ;;  %v581_v46 = vpop.f32.mrf.mxu0 }
  0xfb   : > { %vm2643_vm8 = vcmp.eq.f32.partialorder %v1242_v9, 8.507059e+37  ;;  %v1364_v6 = vand.u32 2147483648, %v2591_v35  ;;  %v1006_v29 = vsel %vm2586_vm15, %v1005_v58, %v1001_v17  ;;  %vm1239_vm10 = vweird.f32 %v2019_v13 }
  0xfc   : > { %v1759_v57 = vmul.f32 -1.442695, %v2636_v15  ;;  %v1767_v32 = vmul.f32 -1.442695, %v2639_v62  ;;  %v2021_v33 = vpop.eup %2020  ;;  %v1431_v31 = vmul.f32 %v1006_v29, %v2457_v8  ;;  %v1121_v22 = vsel %vm1120_vm9, %v2017_v55, %v1117_v30  ;;  %vm1240_vm12 = vmor %vm1238_vm5, %vm1239_vm10 }
  0xfd   : > { %v1235_v34 = vsub.f32 1.0, %v1234_v18  ;;  %v2657_v39 = vadd.f32 %v2216_v25, %v772_v16  ;;  %v1126_v48 = vsel %vm2601_vm1, %v1125_v12, %v1121_v22  ;;  %v1354_v45 = vmul.f32 %v2021_v33, %v2591_v35 }
  0xfe   : > { %vm1359_vm11 = vweird.f32 %v2021_v33  ;;  %2022 = vpow2.f32 %v1759_v57  ;;  %v1821_v26 = vpack.c.bf16 %v1431_v31, %v2576_v47  ;;  %v1439_v8 = vmul.f32 %v1126_v48, %v2474_v23 }
  0xff   : > { %v1236_v51 = vmul.f32 %v2019_v13, %v1235_v34  ;;  %2024 = vpow2.f32 %v1767_v32  ;;  %v1355_v53 = vsub.f32 1.0, %v1354_v45  ;;  %v1775_v54 = vmul.f32 -1.442695, %v2657_v39 }
 0x100   : > { %v780_v55 = vmul.f32 %v2211_v24, %v639_v28  ;;  %v757_v20 = vmul.f32 %v2211_v24, %v581_v46  ;;  %1893 = vst [vmem:[%s2437_s23 + $0x8] sm:$0xff] %v1821_v26   ;;  %v1841_v58 = vpack.c.bf16 %v1439_v8, %v1438_v42  ;;  %v765_v59 = vmul.f32 %v2211_v24, %v601_v49 }
 0x101   : > { %v1237_v41 = vadd.f32 %v2019_v13, %v1236_v51  ;;  %v773_v63 = vmul.f32 %v2211_v24, %v621_v19  ;;  %v1356_v23 = vmul.f32 %v2021_v33, %v1355_v53  ;;  %2026 = vpow2.f32 %v1775_v54  ;;  %v604_v19 = vpop.f32.mrf.mxu1 }
 0x102   : > { %v2674_v47 = vadd.f32 %v2216_v25, %v780_v55  ;;  %v2677_v52 = vadd.f32 %v2216_v25, %v757_v20  ;;  %v1351_v61 = vsel %vm2627_vm6, %v2570_v38, %v1346_v4  ;;  %1897 = vst [vmem:[%s2437_s23 + $0x28] sm:$0xff] %v1841_v58   ;;  %vm1358_vm13 = vweird.f32 %v2591_v35  ;;  %v584_v22 = vpop.f32.mrf.mxu0 }
 0x103   : > { %v1241_v21 = vsel %vm1240_vm12, %v2019_v13, %v1237_v41  ;;  %vm2684_vm14 = vcmp.eq.f32.partialorder %v1362_v56, 8.507059e+37  ;;  %v1357_v2 = vadd.f32 %v2021_v33, %v1356_v23  ;;  %v2692_v5 = vadd.f32 %v2216_v25, %v765_v59  ;;  %vm1360_vm15 = vmor %vm1358_vm13, %vm1359_vm11 }
 0x104   : > { %v2023_v40 = vpop.eup %2022  ;;  %v1246_v37 = vsel %vm2643_vm8, %v1245_v44, %v1241_v21  ;;  %v1783_v3 = vmul.f32 -1.442695, %v2674_v47  ;;  %v1365_v35 = vor.u32 1.1754944e-38, %v1364_v6  ;;  %v2699_v42 = vadd.f32 %v2216_v25, %v773_v63 }
 0x105   : > { %v2025_v7 = vpop.eup %2024  ;;  %v1447_v38 = vmul.f32 %v1246_v37, %v2477_v27  ;;  %v2696_v9 = vadd.f32 1.0, %v2023_v40  ;;  %v1361_v12 = vsel %vm1360_vm15, %v2021_v33, %v1357_v2  ;;  %v1760_v50 = vmul.f32 -1.442695, %v2677_v52  ;;  %v2884_v37 = vld [vmem:[%s3136_s2] ss:$0 sm:$0xff] }
 0x106   : > { %v2701_v4 = vadd.f32 1.0, %v2025_v7  ;;  %2028 = vpow2.f32 %v1783_v3  ;;  %v1454_v36 = vmul.f32 %v1351_v61, %v2450_v0  ;;  %v1366_v44 = vsel %vm2684_vm14, %v1365_v35, %v1361_v12 }
 0x107   : > { %v1861_v27 = vpack.c.bf16 %v1447_v38, %v2612_v10  ;;  %2030 = vrcp.f32 %v2696_v9  ;;  %v2027_v13 = vpop.eup %2026  ;;  %v1455_v14 = vmul.f32 %v1366_v44, %v2494_v43  ;;  %v1768_v56 = vmul.f32 -1.442695, %v2692_v5 }
 0x108   : > { %2032 = vrcp.f32 %v2701_v4  ;;  %v781_v16 = vmul.f32 %v2211_v24, %v641_v11  ;;  %v2714_v17 = vadd.f32 1.0, %v2027_v13  ;;  %v1776_v10 = vmul.f32 -1.442695, %v2699_v42 }
 0x109   : > { %1901 = vst [vmem:[%s2437_s23 + $0x48] sm:$0xff] %v1861_v27   ;;  %v1881_v0 = vpack.c.bf16 %v1455_v14, %v1454_v36  ;;  %2034 = vpow2.f32 %v1760_v50  ;;  %v1019_v18 = vand.u32 2147483648, %v2696_v9  ;;  %v1139_v6 = vand.u32 2147483648, %v2701_v4 }
 0x10a   : > { %2036 = vrcp.f32 %v2714_v17  ;;  %v2721_v43 = vadd.f32 %v2216_v25, %v781_v16  ;;  %vm1013_vm0 = vweird.f32 %v2696_v9  ;;  %v1017_v32 = vand.u32 2147483647, %v2696_v9 }
 0x10b   : > { %1905 = vst [vmem:[%s2437_s23 + $0x68] sm:$0xff] %v1881_v0   ;;  %2038 = vpow2.f32 %v1768_v56  ;;  %vm1133_vm1 = vweird.f32 %v2701_v4  ;;  %v1137_v31 = vand.u32 2147483647, %v2701_v4  ;;  %v1020_v48 = vor.u32 1.1754944e-38, %v1019_v18 }
 0x10c   : > { %v2029_v30 = vpop.eup %2028  ;;  %2040 = vpow2.f32 %v1776_v10  ;;  %v1257_v45 = vand.u32 2147483647, %v2714_v17  ;;  %v1784_v49 = vmul.f32 -1.442695, %v2721_v43  ;;  %v1140_v51 = vor.u32 1.1754944e-38, %v1139_v6 }
 0x10d   : > { %v2723_v60 = vpop.eup %2030  ;;  %v2726_v28 = vadd.f32 1.0, %v2029_v30  ;;  %vm1253_vm2 = vweird.f32 %v2714_v17  ;;  %vm2745_vm3 = vcmp.eq.f32.partialorder %v1017_v32, 8.507059e+37  ;;  %v1259_v41 = vand.u32 2147483648, %v2714_v17 }
 0x10e   : > { %v2728_v29 = vpop.eup %2032  ;;  %v1009_v57 = vmul.f32 %v2723_v60, %v2696_v9  ;;  %v758_v59 = vmul.f32 %v2211_v24, %v584_v22  ;;  %vm1014_vm4 = vweird.f32 %v2723_v60  ;;  %vm2754_vm5 = vcmp.eq.f32.partialorder %v1137_v31, 8.507059e+37  ;;  %v2897_v9 = vld [vmem:[%s3137_s3] ss:$0 sm:$0xff] }
 0x10f   : > { %v1129_v33 = vmul.f32 %v2728_v29, %v2701_v4  ;;  %2042 = vrcp.f32 %v2726_v28  ;;  %v2035_v34 = vpop.eup %2034  ;;  %v766_v61 = vmul.f32 %v2211_v24, %v604_v19  ;;  %vm2761_vm6 = vcmp.eq.f32.partialorder %v1257_v45, 8.507059e+37  ;;  %vm2781_vm9 = vmor %vm1013_vm0, %vm1014_vm4 }
 0x110   : > { %v1010_v46 = vsub.f32 1.0, %v1009_v57  ;;  %v2037_v26 = vpop.eup %2036  ;;  %v2742_v53 = vadd.f32 1.0, %v2035_v34  ;;  %vm1134_vm7 = vweird.f32 %v2728_v29  ;;  %v1379_v7 = vand.u32 2147483648, %v2726_v28 }
 0x111   : > { %v1130_v8 = vsub.f32 1.0, %v1129_v33  ;;  %v2039_v54 = vpop.eup %2038  ;;  %v1249_v58 = vmul.f32 %v2037_v26, %v2714_v17  ;;  %vm1254_vm8 = vweird.f32 %v2037_v26  ;;  %v2775_v11 = vadd.f32 %v2216_v25, %v758_v59  ;;  %vm2796_vm10 = vmor %vm1133_vm1, %vm1134_vm7 }
 0x112   : > { %v1011_v55 = vmul.f32 %v2723_v60, %v1010_v46  ;;  %2044 = vrcp.f32 %v2742_v53  ;;  %v2041_v21 = vpop.eup %2040  ;;  %v2770_v38 = vadd.f32 1.0, %v2039_v54  ;;  %v1260_v50 = vor.u32 1.1754944e-38, %v1259_v41  ;;  %vm2807_vm11 = vmor %vm1253_vm2, %vm1254_vm8  ;;  %v624_v41 = vpop.f32.mrf.mxu2 }
 0x113   : > { %v1131_v63 = vmul.f32 %v2728_v29, %v1130_v8  ;;  %v1250_v40 = vsub.f32 1.0, %v1249_v58  ;;  %2046 = vpow2.f32 %v1784_v49  ;;  %v1377_v36 = vand.u32 2147483647, %v2726_v28 }
 0x114   : > { %v1012_v1 = vadd.f32 %v2723_v60, %v1011_v55  ;;  %v2786_v27 = vadd.f32 1.0, %v2041_v21  ;;  %v2789_v44 = vadd.f32 %v2216_v25, %v766_v61  ;;  %v1032_v16 = vand.u32 2147483647, %v2742_v53 }
 0x115   : > { %v2765_v2 = vpop.eup %2042  ;;  %v1132_v3 = vadd.f32 %v2728_v29, %v1131_v63  ;;  %v1251_v24 = vmul.f32 %v2037_v26, %v1250_v40  ;;  %vm1373_vm12 = vweird.f32 %v2726_v28  ;;  %v2812_v4 = vor.u32 1.1754944e-38, %v1379_v7 }
 0x116   : > { %v1369_v35 = vmul.f32 %v2765_v2, %v2726_v28  ;;  %v1016_v13 = vsel %vm2781_vm9, %v2723_v60, %v1012_v1  ;;  %v1034_v30 = vand.u32 2147483648, %v2742_v53  ;;  %2048 = vrcp.f32 %v2770_v38 }
 0x117   : > { %v1252_v14 = vadd.f32 %v2037_v26, %v1251_v24  ;;  %v1136_v25 = vsel %vm2796_vm10, %v2728_v29, %v1132_v3  ;;  %vm1028_vm13 = vweird.f32 %v2742_v53  ;;  %v1761_v17 = vmul.f32 -1.442695, %v2775_v11 }
 0x118   : > { %v1370_v56 = vsub.f32 1.0, %v1369_v35  ;;  %v2045_v0 = vpop.eup %2044  ;;  %v1021_v29 = vsel %vm2745_vm3, %v1020_v48, %v1016_v13  ;;  %vm1374_vm14 = vweird.f32 %v2765_v2  ;;  %2050 = vrcp.f32 %v2786_v27 }
 0x119   : > { %v2047_v18 = vpop.eup %2046  ;;  %v1256_v60 = vsel %vm2807_vm11, %v2037_v26, %v1252_v14  ;;  %v1024_v6 = vmul.f32 %v2045_v0, %v2742_v53  ;;  %v1141_v32 = vsel %vm2754_vm5, %v1140_v51, %v1136_v25  ;;  %vm2828_vm15 = vcmp.eq.f32.partialorder %v1032_v16, 8.507059e+37  ;;  %vm2865_vm5 = vmor %vm1373_vm12, %vm1374_vm14  ;;  %v586_v25 = vpop.f32.mrf.mxu0 }
 0x11a   : > { %v1371_v57 = vmul.f32 %v2765_v2, %v1370_v56  ;;  %v1152_v22 = vand.u32 2147483647, %v2770_v38  ;;  %v1261_v34 = vsel %vm2761_vm6, %v1260_v50, %v1256_v60  ;;  %vm1029_vm0 = vweird.f32 %v2045_v0  ;;  %v644_v50 = vpop.f32.mrf.mxu3 }
 0x11b   : > { %v1025_v33 = vsub.f32 1.0, %v1024_v6  ;;  %v1035_v46 = vor.u32 1.1754944e-38, %v1034_v30  ;;  %v2835_v48 = vadd.f32 1.0, %v2047_v18  ;;  %v1154_v49 = vand.u32 2147483648, %v2770_v38  ;;  %vm1030_vm3 = vmor %vm1028_vm13, %vm1029_vm0 }
 0x11c   : > { %2052 = vpow2.f32 %v1761_v17  ;;  %v1769_v19 = vmul.f32 -1.442695, %v2789_v44  ;;  %v2049_v26 = vpop.eup %2048  ;;  %v1432_v8 = vmul.f32 %v1021_v29, %v2636_v15  ;;  %v2841_v51 = vmul.f32 %v1141_v32, %v2639_v62 }
 0x11d   : > { %v1026_v45 = vmul.f32 %v2045_v0, %v1025_v33  ;;  %v2844_v54 = vadd.f32 %v2765_v2, %v1371_v57  ;;  %2054 = vrcp.f32 %v2835_v48  ;;  %v1144_v20 = vmul.f32 %v2049_v26, %v2770_v38 }
 0x11e   : > { %vm1148_vm1 = vweird.f32 %v2770_v38  ;;  %vm2849_vm2 = vcmp.eq.f32.partialorder %v1152_v22, 8.507059e+37  ;;  %v2051_v59 = vpop.eup %2050  ;;  %v2854_v15 = vmul.f32 %v1261_v34, %v2657_v39  ;;  %vm1268_vm4 = vweird.f32 %v2786_v27  ;;  %v606_v22 = vpop.f32.mrf.mxu1 }
 0x11f   : > { %v1027_v55 = vadd.f32 %v2045_v0, %v1026_v45  ;;  %v1272_v62 = vand.u32 2147483647, %v2786_v27  ;;  %2056 = vpow2.f32 %v1769_v19  ;;  %vm2869_vm6 = vcmp.eq.f32.partialorder %v1377_v36, 8.507059e+37 }
 0x120   : > { %v1145_v53 = vsub.f32 1.0, %v1144_v20  ;;  %v1155_v61 = vor.u32 1.1754944e-38, %v1154_v49  ;;  %v1264_v21 = vmul.f32 %v2051_v59, %v2786_v27  ;;  %v1376_v1 = vsel %vm2865_vm5, %v2765_v2, %v2844_v54  ;;  %v626_v20 = vpop.f32.mrf.mxu2 }
 0x121   : > { %v1031_v23 = vsel %vm1030_vm3, %v2045_v0, %v1027_v55  ;;  %v1274_v40 = vand.u32 2147483648, %v2786_v27  ;;  %v774_v3 = vmul.f32 %v2884_v37, %v624_v41  ;;  %vm1149_vm7 = vweird.f32 %v2049_v26 }
 0x122   : > { %v1036_v28 = vsel %vm2828_vm15, %v1035_v46, %v1031_v23  ;;  %v2053_v7 = vpop.eup %2052  ;;  %v1146_v35 = vmul.f32 %v2049_v26, %v1145_v53  ;;  %v1265_v12 = vsub.f32 1.0, %v1264_v21  ;;  %vm1269_vm8 = vweird.f32 %v2051_v59  ;;  %vm1150_vm10 = vmor %vm1148_vm1, %vm1149_vm7  ;;  %v646_v41 = vpop.f32.mrf.mxu3 }
 0x123   : > { %v1433_v24 = vmul.f32 %v1036_v28, %v2677_v52  ;;  %v2055_v2 = vpop.eup %2054  ;;  %vm2888_vm9 = vcmp.eq.f32.partialorder %v1272_v62, 8.507059e+37  ;;  %v2892_v13 = vadd.f32 1.0, %v2053_v7  ;;  %v2900_v52 = vadd.f32 %v2897_v9, %v774_v3  ;;  %vm1270_vm11 = vmor %vm1268_vm4, %vm1269_vm8 }
 0x124   : > { %v1147_v56 = vadd.f32 %v2049_v26, %v1146_v35  ;;  %v1266_v16 = vmul.f32 %v2051_v59, %v1265_v12  ;;  %v1384_v0 = vmul.f32 %v2055_v2, %v2835_v48  ;;  %v1275_v30 = vor.u32 1.1754944e-38, %v1274_v40 }
 0x125   : > { %v1826_v14 = vpack.c.bf16 %v1433_v24, %v1432_v8  ;;  %v2057_v10 = vpop.eup %2056  ;;  %v1392_v18 = vand.u32 2147483647, %v2835_v48  ;;  %v1394_v60 = vand.u32 2147483648, %v2835_v48  ;;  %2058 = vrcp.f32 %v2892_v13 }
 0x126   : > { %v1151_v6 = vsel %vm1150_vm10, %v2049_v26, %v1147_v56  ;;  %v1267_v17 = vadd.f32 %v2051_v59, %v1266_v16  ;;  %v1385_v29 = vsub.f32 1.0, %v1384_v0  ;;  %v782_v57 = vmul.f32 %v2884_v37, %v644_v50 }
 0x127   : > { %1894 = vst [vmem:[%s2437_s23 + $0x10] sm:$0xff] %v1826_v14   ;;  %v1156_v32 = vsel %vm2849_vm2, %v1155_v61, %v1151_v6  ;;  %v2916_v38 = vadd.f32 1.0, %v2057_v10  ;;  %v1777_v33 = vmul.f32 -1.442695, %v2900_v52  ;;  %v759_v31 = vmul.f32 %v2884_v37, %v586_v25 }
 0x128   : > { %v1441_v34 = vmul.f32 %v1156_v32, %v2692_v5  ;;  %v1271_v46 = vsel %vm1270_vm11, %v2051_v59, %v1267_v17  ;;  %v1386_v45 = vmul.f32 %v2055_v2, %v1385_v29  ;;  %vm1389_vm12 = vweird.f32 %v2055_v2 }
 0x129   : > { %v1381_v49 = vsel %vm2869_vm6, %v2812_v4, %v1376_v1  ;;  %v1276_v27 = vsel %vm2888_vm9, %v1275_v30, %v1271_v46  ;;  %vm1388_vm13 = vweird.f32 %v2835_v48  ;;  %2060 = vrcp.f32 %v2916_v38 }
 0x12a   : > { %v1846_v19 = vpack.c.bf16 %v1441_v34, %v2841_v51  ;;  %v1449_v26 = vmul.f32 %v1276_v27, %v2699_v42  ;;  %v1387_v5 = vadd.f32 %v2055_v2, %v1386_v45  ;;  %v767_v8 = vmul.f32 %v2884_v37, %v606_v22  ;;  %vm1390_vm14 = vmor %vm1388_vm13, %vm1389_vm12 }
 0x12b   : > { %v2931_v54 = vpop.eup %2058  ;;  %v1395_v55 = vor.u32 1.1754944e-38, %v1394_v60  ;;  %2062 = vpow2.f32 %v1777_v33  ;;  %v2934_v4 = vadd.f32 %v2897_v9, %v782_v57  ;;  %v2937_v48 = vadd.f32 %v2897_v9, %v759_v31 }
 0x12c   : > { %1898 = vst [vmem:[%s2437_s23 + $0x30] sm:$0xff] %v1846_v19   ;;  %v1866_v51 = vpack.c.bf16 %v1449_v26, %v2854_v15  ;;  %v1391_v42 = vsel %vm1390_vm14, %v2055_v2, %v1387_v5  ;;  %vm1393_vm15 = vcmp.eq.f32.partialorder %v1392_v18, 8.507059e+37  ;;  %v1039_v58 = vmul.f32 %v2931_v54, %v2892_v13 }
 0x12d   : > { %v1456_v59 = vmul.f32 %v1381_v49, %v2674_v47  ;;  %v1396_v62 = vsel %vm1393_vm15, %v1395_v55, %v1391_v42  ;;  %v1785_v63 = vmul.f32 -1.442695, %v2934_v4  ;;  %v1762_v39 = vmul.f32 -1.442695, %v2937_v48 }
 0x12e   : > { %1902 = vst [vmem:[%s2437_s23 + $0x50] sm:$0xff] %v1866_v51   ;;  %v1457_v23 = vmul.f32 %v1396_v62, %v2721_v43  ;;  %v1040_v53 = vsub.f32 1.0, %v1039_v58  ;;  %v2949_v15 = vadd.f32 %v2897_v9, %v767_v8  ;;  %v775_v61 = vmul.f32 %v2884_v37, %v626_v20 }
 0x12f   : > { %v2952_v21 = vpop.eup %2060  ;;  %2064 = vpow2.f32 %v1785_v63  ;;  %v783_v47 = vmul.f32 %v2884_v37, %v646_v41  ;;  %vm1043_vm0 = vweird.f32 %v2892_v13  ;;  %vm1044_vm1 = vweird.f32 %v2931_v54 }
 0x130   : > { %v1886_v1 = vpack.c.bf16 %v1457_v23, %v1456_v59  ;;  %v1041_v28 = vmul.f32 %v2931_v54, %v1040_v53  ;;  %v1159_v40 = vmul.f32 %v2952_v21, %v2916_v38  ;;  %2066 = vpow2.f32 %v1762_v39  ;;  %vm2981_vm2 = vmor %vm1043_vm0, %vm1044_vm1 }
 0x131   : > { %v2063_v3 = vpop.eup %2062  ;;  %v1770_v43 = vmul.f32 -1.442695, %v2949_v15  ;;  %v2960_v7 = vadd.f32 %v2897_v9, %v775_v61  ;;  %v2963_v24 = vadd.f32 %v2897_v9, %v783_v47  ;;  %v1049_v14 = vand.u32 2147483648, %v2892_v13 }
 0x132   : > { %1906 = vst [vmem:[%s2437_s23 + $0x70] sm:$0xff] %v1886_v1   ;;  %v1160_v35 = vsub.f32 1.0, %v1159_v40  ;;  %v2966_v12 = vadd.f32 1.0, %v2063_v3  ;;  %v1042_v2 = vadd.f32 %v2931_v54, %v1041_v28  ;;  %v1047_v56 = vand.u32 2147483647, %v2892_v13 }
 0x133   : > { %2068 = vpow2.f32 %v1770_v43  ;;  %v1778_v37 = vmul.f32 -1.442695, %v2960_v7  ;;  %v1786_v50 = vmul.f32 -1.442695, %v2963_v24  ;;  %vm1163_vm3 = vweird.f32 %v2916_v38 }
 0x134   : > { %v1161_v36 = vmul.f32 %v2952_v21, %v1160_v35  ;;  %2070 = vrcp.f32 %v2966_v12  ;;  %v1046_v10 = vsel %vm2981_vm2, %v2931_v54, %v1042_v2  ;;  %vm1164_vm4 = vweird.f32 %v2952_v21 }
 0x135   : > { %v2065_v9 = vpop.eup %2064  ;;  %2072 = vpow2.f32 %v1778_v37  ;;  %v1050_v60 = vor.u32 1.1754944e-38, %v1049_v14  ;;  %v1167_v13 = vand.u32 2147483647, %v2916_v38  ;;  %v1169_v6 = vand.u32 2147483648, %v2916_v38  ;;  %vm3003_vm6 = vmor %vm1163_vm3, %vm1164_vm4 }
 0x136   : > { %v2977_v16 = vadd.f32 1.0, %v2065_v9  ;;  %2074 = vpow2.f32 %v1786_v50  ;;  %v2067_v0 = vpop.eup %2066  ;;  %v1162_v30 = vadd.f32 %v2952_v21, %v1161_v36  ;;  %vm1048_vm5 = vcmp.eq.f32.partialorder %v1047_v56, 8.507059e+37 }
 0x137   : > { %v2994_v17 = vadd.f32 1.0, %v2067_v0  ;;  %v1289_v57 = vand.u32 2147483648, %v2966_v12  ;;  %v1051_v31 = vsel %vm1048_vm5, %v1050_v60, %v1046_v10  ;;  %vm1168_vm7 = vcmp.eq.f32.partialorder %v1167_v13, 8.507059e+37 }
 0x138   : > { %2076 = vrcp.f32 %v2977_v16  ;;  %v1166_v45 = vsel %vm3003_vm6, %v2952_v21, %v1162_v30  ;;  %v1170_v49 = vor.u32 1.1754944e-38, %v1169_v6  ;;  %v1287_v38 = vand.u32 2147483647, %v2966_v12 }
 0x139   : > { %v2069_v18 = vpop.eup %2068  ;;  %2078 = vrcp.f32 %v2994_v17  ;;  %v3018_v26 = vmul.f32 %v1051_v31, %v2775_v11  ;;  %vm1283_vm8 = vweird.f32 %v2966_v12  ;;  %v3021_v5 = vor.u32 1.1754944e-38, %v1289_v57 }
 0x13a   : > { %v2996_v29 = vpop.eup %2070  ;;  %v2999_v32 = vadd.f32 1.0, %v2069_v18  ;;  %v1171_v55 = vsel %vm1168_vm7, %v1170_v49, %v1166_v45  ;;  %vm1403_vm9 = vweird.f32 %v2977_v16  ;;  %v1409_v51 = vand.u32 2147483648, %v2977_v16 }
 0x13b   : > { %v2073_v33 = vpop.eup %2072  ;;  %v1279_v34 = vmul.f32 %v2996_v29, %v2966_v12  ;;  %v1407_v42 = vand.u32 2147483647, %v2977_v16  ;;  %v1062_v11 = vand.u32 2147483647, %v2994_v17  ;;  %v1064_v58 = vand.u32 2147483648, %v2994_v17 }
 0x13c   : > { %v2075_v46 = vpop.eup %2074  ;;  %2080 = vrcp.f32 %v2999_v32  ;;  %v3023_v8 = vadd.f32 1.0, %v2073_v33  ;;  %v1182_v63 = vand.u32 2147483647, %v2999_v32  ;;  %v3039_v23 = vmul.f32 %v1171_v55, %v2789_v44 }
 0x13d   : > { %v1280_v27 = vsub.f32 1.0, %v1279_v34  ;;  %v3025_v54 = vadd.f32 1.0, %v2075_v46  ;;  %vm1284_vm10 = vweird.f32 %v2996_v29  ;;  %v1184_v61 = vand.u32 2147483648, %v2999_v32 }
 0x13e   : > { %v3015_v19 = vpop.eup %2076  ;;  %2082 = vrcp.f32 %v3023_v8  ;;  %v1410_v47 = vor.u32 1.1754944e-38, %v1409_v51  ;;  %vm1058_vm11 = vweird.f32 %v2994_v17  ;;  %vm3047_vm12 = vcmp.eq.f32.partialorder %v1062_v11, 8.507059e+37  ;;  %vm3071_vm3 = vmor %vm1283_vm8, %vm1284_vm10 }
 0x13f   : > { %v1399_v20 = vmul.f32 %v3015_v19, %v2977_v16  ;;  %v2079_v41 = vpop.eup %2078  ;;  %v1281_v59 = vmul.f32 %v2996_v29, %v1280_v27  ;;  %2084 = vrcp.f32 %v3025_v54  ;;  %v1065_v44 = vor.u32 1.1754944e-38, %v1064_v58 }
 0x140   : > { %v1054_v53 = vmul.f32 %v2079_v41, %v2994_v17  ;;  %vm1178_vm13 = vweird.f32 %v2999_v32  ;;  %vm3053_vm14 = vcmp.eq.f32.partialorder %v1287_v38, 8.507059e+37  ;;  %vm1404_vm15 = vweird.f32 %v3015_v19 }
 0x141   : > { %v1400_v62 = vsub.f32 1.0, %v1399_v20  ;;  %v1282_v3 = vadd.f32 %v2996_v29, %v1281_v59  ;;  %vm3058_vm0 = vcmp.eq.f32.partialorder %v1182_v63, 8.507059e+37  ;;  %vm3063_vm1 = vcmp.eq.f32.partialorder %v1407_v42, 8.507059e+37  ;;  %vm3081_vm6 = vmor %vm1403_vm9, %vm1404_vm15 }
 0x142   : > { %v2081_v39 = vpop.eup %2080  ;;  %v1055_v28 = vsub.f32 1.0, %v1054_v53  ;;  %vm1059_vm2 = vweird.f32 %v2079_v41  ;;  %v1185_v14 = vor.u32 1.1754944e-38, %v1184_v61  ;;  %vm1298_vm5 = vweird.f32 %v3023_v8 }
 0x143   : > { %v1401_v21 = vmul.f32 %v3015_v19, %v1400_v62  ;;  %v1174_v1 = vmul.f32 %v2081_v39, %v2999_v32  ;;  %vm1179_vm4 = vweird.f32 %v2081_v39  ;;  %v1302_v12 = vand.u32 2147483647, %v3023_v8  ;;  %vm1060_vm7 = vmor %vm1058_vm11, %vm1059_vm2 }
 0x144   : > { %v2083_v50 = vpop.eup %2082  ;;  %v1056_v9 = vmul.f32 %v2079_v41, %v1055_v28  ;;  %v1304_v60 = vand.u32 2147483648, %v3023_v8  ;;  %v1286_v6 = vsel %vm3071_vm3, %v2996_v29, %v1282_v3  ;;  %v1422_v33 = vand.u32 2147483647, %v3025_v54  ;;  %vm1180_vm8 = vmor %vm1178_vm13, %vm1179_vm4 }
 0x145   : > { %v1175_v35 = vsub.f32 1.0, %v1174_v1  ;;  %v1402_v2 = vadd.f32 %v3015_v19, %v1401_v21  ;;  %v2085_v56 = vpop.eup %2084  ;;  %v1294_v10 = vmul.f32 %v2083_v50, %v3023_v8  ;;  %v1424_v46 = vand.u32 2147483648, %v3025_v54 }
 0x146   : > { %v1057_v18 = vadd.f32 %v2079_v41, %v1056_v9  ;;  %v1414_v13 = vmul.f32 %v2085_v56, %v3025_v54  ;;  %vm1299_vm9 = vweird.f32 %v2083_v50  ;;  %vm1419_vm10 = vweird.f32 %v2085_v56 }
 0x147   : > { %v1176_v25 = vmul.f32 %v2081_v39, %v1175_v35  ;;  %v1295_v16 = vsub.f32 1.0, %v1294_v10  ;;  %v1406_v31 = vsel %vm3081_vm6, %v3015_v19, %v1402_v2  ;;  %vm1303_vm11 = vcmp.eq.f32.partialorder %v1302_v12, 8.507059e+37 }
 0x148   : > { %v1061_v22 = vsel %vm1060_vm7, %v2079_v41, %v1057_v18  ;;  %v1415_v34 = vsub.f32 1.0, %v1414_v13  ;;  %vm1418_vm13 = vweird.f32 %v3025_v54  ;;  %v1291_v55 = vsel %vm3053_vm14, %v3021_v5, %v1286_v6 }
 0x149   : > { %v1177_v57 = vadd.f32 %v2081_v39, %v1176_v25  ;;  %v1066_v17 = vsel %vm3047_vm12, %v1065_v44, %v1061_v22  ;;  %v1296_v45 = vmul.f32 %v2083_v50, %v1295_v16  ;;  %vm1300_vm12 = vmor %vm1298_vm5, %vm1299_vm9  ;;  %v1411_v42 = vsel %vm3063_vm1, %v1410_v47, %v1406_v31 }
 0x14a   : > { %v1435_v49 = vmul.f32 %v1066_v17, %v2937_v48  ;;  %v1416_v38 = vmul.f32 %v2085_v56, %v1415_v34  ;;  %v1305_v48 = vor.u32 1.1754944e-38, %v1304_v60  ;;  %vm1420_vm15 = vmor %vm1418_vm13, %vm1419_vm10  ;;  %v1425_v54 = vor.u32 1.1754944e-38, %v1424_v46 }
 0x14b   : > { %v1181_v29 = vsel %vm1180_vm8, %v2081_v39, %v1177_v57  ;;  %v1297_v19 = vadd.f32 %v2083_v50, %v1296_v45  ;;  %vm1423_vm14 = vcmp.eq.f32.partialorder %v1422_v33, 8.507059e+37  ;;  %v1458_v59 = vmul.f32 %v1411_v42, %v2934_v4 }
 0x14c   : > { %v1186_v27 = vsel %vm3058_vm0, %v1185_v14, %v1181_v29  ;;  %v1831_v20 = vpack.c.bf16 %v1435_v49, %v3018_v26  ;;  %v1417_v51 = vadd.f32 %v2085_v56, %v1416_v38  ;;  %v1450_v26 = vmul.f32 %v1291_v55, %v2900_v52 }
 0x14d   : > { %v1443_v32 = vmul.f32 %v1186_v27, %v2949_v15  ;;  %v1301_v11 = vsel %vm1300_vm12, %v2083_v50, %v1297_v19 }
 0x14e   : > { %1895 = vst [vmem:[%s2437_s23 + $0x18] sm:$0xff] %v1831_v20   ;;  %v1306_v58 = vsel %vm1303_vm11, %v1305_v48, %v1301_v11  ;;  %v1421_v5 = vsel %vm1420_vm15, %v2085_v56, %v1417_v51 }
 0x14f   : > { %v1851_v15 = vpack.c.bf16 %v1443_v32, %v3039_v23  ;;  %v1451_v8 = vmul.f32 %v1306_v58, %v2960_v7  ;;  %v1426_v41 = vsel %vm1423_vm14, %v1425_v54, %v1421_v5 }
 0x150   : > { %v1459_v62 = vmul.f32 %v1426_v41, %v2963_v24 }
 0x151   : > { %1899 = vst [vmem:[%s2437_s23 + $0x38] sm:$0xff] %v1851_v15   ;;  %v1871_v63 = vpack.c.bf16 %v1451_v8, %v1450_v26 }
 0x152   : > { %v1891_v39 = vpack.c.bf16 %v1459_v62, %v1458_v59 }
 0x153   : > { %1903 = vst [vmem:[%s2437_s23 + $0x58] sm:$0xff] %v1871_v63  }
 0x154   : > { %1907 = vst [vmem:[%s2437_s23 + $0x78] sm:$0xff] %v1891_v39  }
 0x155 PF: > { %s14_s17 = sadd.s32 1, %s2110_s17   ;;  %s3219_s15 = smov %s2106_s16 }
 0x156   : > { %p11_p5 = scmp.ge.s32.totalorder %s14_s17, 12   ;;  %s3220_s16 = smov %s3222_s18 }
 0x158   :  { %13 = sbr.rel (!%p11_p5) target bundleno = 2 (0x2), region = 83 }

</bundles_post_ra>
